<compile_context>
chip_gen: v5e
topology: v5e:2x2
jax: 0.10.0
libtpu: 0.0.40
codegen_flags: <defaults>
</compile_context>

<pallas_src>
import functools
import math

import jax
import jax.numpy as jnp
from jax import lax
from jax.experimental import pallas as pl
from jax.experimental.pallas import tpu as pltpu

_SQRT_HALF = math.sqrt(0.5)
_VMEM_LIMIT_BYTES = 48 * 1024 * 1024


# --------------------------------------------------------------------------------------
# Fused kernel: folded pre-attn convs + SAITS time EncoderLayer + gated res/skip output.
# One grid step per batch element; everything stays in VMEM.
# --------------------------------------------------------------------------------------
def _make_fused_kernel(n_head: int, d_k: int, d_v: int, channels: int):
    inv_temp = 1.0 / math.sqrt(d_k)

    def kernel(x_ref, cond_ref, emb_ref,
               wx_ref, wc_ref, wd_ref, bpre_ref,
               ln1_g_ref, ln1_b_ref, wq_ref, wk_ref, wv_ref, wfc_ref,
               ln2_g_ref, ln2_b_ref, w1_ref, b1_ref, w2_ref, b2_ref,
               wrs_ref, brs_ref,
               out_ref, skip_ref, attn_ref,
               ctx_ref):
        f32 = jnp.float32
        x_cf = x_ref[0]                       # (D, L)  channel-first (NCL)
        cond_cf = cond_ref[0]                 # (D, L)
        cdt = x_cf.dtype                      # MXU operand dtype (activation dtype)
        seq = x_cf.shape[1]

        # ---- Prologue: folded 1x1 convs, produced directly channel-last (L, M) ----
        x_cl = x_cf.T                         # (L, D)  small transpose (D << M)
        c_cl = cond_cf.T                      # (L, D)
        d_row = jnp.dot(emb_ref[0], wd_ref[...], preferred_element_type=f32)     # (1, M)
        y = (jnp.dot(x_cl, wx_ref[...], preferred_element_type=f32)
             + jnp.dot(c_cl, wc_ref[...], preferred_element_type=f32)
             + d_row + bpre_ref[...])                                            # (L, M) f32

        # ---- SAITS EncoderLayer: pre-LN multi-head self-attention (diagonal mask) ----
        mu = jnp.mean(y, axis=-1, keepdims=True)
        var = jnp.mean(jnp.square(y - mu), axis=-1, keepdims=True)
        yn = (y - mu) * lax.rsqrt(var + 1e-5)                 # PyTorch default eps=1e-5
        yn = (yn * ln1_g_ref[...] + ln1_b_ref[...]).astype(cdt)

        q = jnp.dot(yn, wq_ref[...], preferred_element_type=f32)     # (L, H*dk)
        k = jnp.dot(yn, wk_ref[...], preferred_element_type=f32)
        v = jnp.dot(yn, wv_ref[...], preferred_element_type=f32).astype(cdt)

        row = lax.broadcasted_iota(jnp.int32, (seq, seq), 0)
        col = lax.broadcasted_iota(jnp.int32, (seq, seq), 1)
        diag = row == col                                      # diagonal attention mask
        dn_bt = (((1,), (1,)), ((), ()))                       # A @ B^T

        for h in range(n_head):
            qh = (q[:, h * d_k:(h + 1) * d_k] * inv_temp).astype(cdt)
            kh = k[:, h * d_k:(h + 1) * d_k].astype(cdt)
            vh = v[:, h * d_v:(h + 1) * d_v]
            s = lax.dot_general(qh, kh, dn_bt, preferred_element_type=f32)   # (L, L) f32
            s = jnp.where(diag, -1e9, s)
            s = s - jnp.max(s, axis=-1, keepdims=True)
            p = jnp.exp(s)
            denom = jnp.sum(p, axis=-1, keepdims=True)         # (L, 1)
            r = pl.reciprocal(denom, approx=True)
            r = r * (2.0 - denom * r)                          # one Newton step -> full f32
            p = p * r                                          # multiply, not (L,L) divide
            attn_ref[0, h] = p.astype(attn_ref.dtype)
            ctx_ref[:, h * d_v:(h + 1) * d_v] = jnp.dot(
                p.astype(cdt), vh, preferred_element_type=f32).astype(ctx_ref.dtype)

        # One big output projection over the concatenated heads.
        attn_out = jnp.dot(ctx_ref[...], wfc_ref[...], preferred_element_type=f32)  # (L, M)
        h1 = attn_out + y                                      # residual (dropout = identity)

        # ---- Pre-LN position-wise FFN (eps = 1e-6) ----
        mu2 = jnp.mean(h1, axis=-1, keepdims=True)
        var2 = jnp.mean(jnp.square(h1 - mu2), axis=-1, keepdims=True)
        hn = (h1 - mu2) * lax.rsqrt(var2 + 1e-6)
        hn = (hn * ln2_g_ref[...] + ln2_b_ref[...]).astype(cdt)
        ff = jnp.dot(hn, w1_ref[...], preferred_element_type=f32) + b1_ref[...]
        ff = jnp.maximum(ff, 0.0).astype(cdt)
        enc = jnp.dot(ff, w2_ref[...], preferred_element_type=f32) + b2_ref[...] + h1  # (L, M)

        # ---- Epilogue: gating + stacked res/skip projection, channel-first (lane-dense L) ----
        enc_cf = enc.T                                         # (M, L)
        gate = enc_cf[:channels, :]
        filt = enc_cf[channels:, :]
        z = (jax.nn.sigmoid(gate) * jnp.tanh(filt)).astype(cdt)              # (C, L)
        rs = jnp.dot(wrs_ref[...], z, preferred_element_type=f32) + brs_ref[...]  # (2D, L)
        d_feat = out_ref.shape[1]
        out_ref[0] = ((x_cf.astype(f32) + rs[:d_feat, :]) * _SQRT_HALF).astype(out_ref.dtype)
        skip_ref[0] = rs[d_feat:, :].astype(skip_ref.dtype)

    return kernel


# --------------------------------------------------------------------------------------
# Wrapper: full ResidualEncoderLayer_new_2.forward
# --------------------------------------------------------------------------------------
def residual_encoder_layer_forward(params, x, cond, diffusion_emb, mask=None, *,
                                   n_head, d_k, d_v):
    del mask  # unused in the reference forward (mask_conv is also unused)
    B, D, L = x.shape
    C = params['init_proj_w'].shape[0]
    M = 2 * C
    E = params['diff_proj_w'].shape[1]
    d_inner = params['ffn_w1'].shape[0]
    dtype = x.dtype
    f32 = jnp.float32

    # ---- fold the 1x1-conv chains (tiny weight-level matmuls, once per call) ----
    w_init = params['init_proj_w'][:, :, 0].astype(f32)       # (C, D)
    w_conv = params['conv_layer_w'][:, :, 0].astype(f32)      # (M, C)
    w_cp = params['cond_proj_w'][:, :, 0].astype(f32)         # (M, D)
    w_cc = params['conv_cond_w'][:, :, 0].astype(f32)         # (M, M)
    w_diff = params['diff_proj_w'].astype(f32)                # (C, E)

    wx_t = (w_conv @ w_init).T.astype(dtype)                  # (D, M)
    wc_t = (w_cc @ w_cp).T.astype(dtype)                      # (D, M)
    wd_t = (w_conv @ w_diff).T.astype(dtype)                  # (E, M)
    b_pre = (w_conv @ (params['init_proj_b'].astype(f32) + params['diff_proj_b'].astype(f32))
             + params['conv_layer_b'].astype(f32)
             + w_cc @ params['cond_proj_b'].astype(f32)
             + params['conv_cond_b'].astype(f32)).reshape(1, M)

    emb_row = diffusion_emb.reshape(B, 1, E).astype(dtype)

    # ---- encoder weights (channel-last orientation) ----
    wq_t = params['wq'].T.astype(dtype)
    wk_t = params['wk'].T.astype(dtype)
    wv_t = params['wv'].T.astype(dtype)
    wfc_t = params['wfc'].T.astype(dtype)
    ln1_g = params['ln1_w'].reshape(1, M).astype(f32)
    ln1_b = params['ln1_b'].reshape(1, M).astype(f32)
    ln2_g = params['ln2_w'].reshape(1, M).astype(f32)
    ln2_b = params['ln2_b'].reshape(1, M).astype(f32)
    w1_t = params['ffn_w1'].T.astype(dtype)
    b1 = params['ffn_b1'].reshape(1, d_inner).astype(f32)
    w2_t = params['ffn_w2'].T.astype(dtype)
    b2 = params['ffn_b2'].reshape(1, M).astype(f32)

    # ---- stacked res/skip projection: one (2D, C) matmul in the kernel ----
    w_rs = jnp.concatenate([params['res_proj_w'][:, :, 0],
                            params['skip_proj_w'][:, :, 0]], axis=0).astype(dtype)   # (2D, C)
    b_rs = jnp.concatenate([params['res_proj_b'],
                            params['skip_proj_b']], axis=0).reshape(2 * D, 1).astype(f32)

    def wspec(*shape):
        zeros = (0,) * len(shape)

        def idx(b):
            return zeros

        return pl.BlockSpec(shape, idx)

    kernel = _make_fused_kernel(n_head, d_k, d_v, C)

    flops_per_b = (4 * L * D * M + 2 * E * M
                   + 2 * L * M * (2 * n_head * d_k + n_head * d_v)
                   + 2 * n_head * L * L * (d_k + d_v)
                   + 2 * L * n_head * d_v * M
                   + 4 * L * M * d_inner
                   + 4 * L * C * D)
    itemsize = jnp.dtype(dtype).itemsize

    out, skip, attn_w = pl.pallas_call(
        kernel,
        out_shape=(jax.ShapeDtypeStruct((B, D, L), dtype),
                   jax.ShapeDtypeStruct((B, D, L), dtype),
                   jax.ShapeDtypeStruct((B, n_head, L, L), dtype)),
        grid=(B,),
        in_specs=[
            pl.BlockSpec((1, D, L), lambda b: (b, 0, 0)),      # x      (NCL)
            pl.BlockSpec((1, D, L), lambda b: (b, 0, 0)),      # cond   (NCL)
            pl.BlockSpec((1, 1, E), lambda b: (b, 0, 0)),      # diffusion emb (row)
            wspec(D, M),               # Wx^T  = (W_conv @ W_init)^T
            wspec(D, M),               # Wc^T  = (W_cc  @ W_cp  )^T
            wspec(E, M),               # Wd^T  = (W_conv @ W_diff)^T
            wspec(1, M),               # folded bias
            wspec(1, M), wspec(1, M),                          # LN1 gamma / beta
            wspec(M, n_head * d_k),                            # Wq^T
            wspec(M, n_head * d_k),                            # Wk^T
            wspec(M, n_head * d_v),                            # Wv^T
            wspec(n_head * d_v, M),                            # Wfc^T
            wspec(1, M), wspec(1, M),                          # LN2 gamma / beta
            wspec(M, d_inner), wspec(1, d_inner),              # FFN W1^T, b1
            wspec(d_inner, M), wspec(1, M),                    # FFN W2^T, b2
            wspec(2 * D, C), wspec(2 * D, 1),                  # stacked res/skip W, b
        ],
        out_specs=(pl.BlockSpec((1, D, L), lambda b: (b, 0, 0)),
                   pl.BlockSpec((1, D, L), lambda b: (b, 0, 0)),
                   pl.BlockSpec((1, n_head, L, L), lambda b: (b, 0, 0, 0))),
        scratch_shapes=[pltpu.VMEM((L, n_head * d_v), dtype)],
        compiler_params=pltpu.CompilerParams(
            dimension_semantics=("parallel",),
            vmem_limit_bytes=_VMEM_LIMIT_BYTES),
        cost_estimate=pl.CostEstimate(
            flops=B * flops_per_b,
            transcendentals=B * (n_head * L * L + 2 * L * C),
            bytes_accessed=itemsize * B * (4 * D * L + E + n_head * L * L)),
    )(x, cond, emb_row, wx_t, wc_t, wd_t, b_pre,
      ln1_g, ln1_b, wq_t, wk_t, wv_t, wfc_t,
      ln2_g, ln2_b, w1_t, b1, w2_t, b2, w_rs, b_rs)

    return out, skip, attn_w


# --------------------------------------------------------------------------------------
# Pure-JAX reference (unfused weights, same math) for correctness checking.
# --------------------------------------------------------------------------------------
def _reference_forward(params, x, cond, diffusion_emb, *, n_head, d_k, d_v):
    B, D, L = x.shape
    C = params['init_proj_w'].shape[0]
    x_proj = jnp.einsum('cd,bdl->bcl', params['init_proj_w'][:, :, 0], x) \
        + params['init_proj_b'][None, :, None]
    cond_p = jnp.einsum('od,bdl->bol', params['cond_proj_w'][:, :, 0], cond) \
        + params['cond_proj_b'][None, :, None]
    diff = diffusion_emb @ params['diff_proj_w'].T + params['diff_proj_b']
    y = x_proj + diff[:, :, None]
    y = jnp.einsum('oc,bcl->bol', params['conv_layer_w'][:, :, 0], y) \
        + params['conv_layer_b'][None, :, None]
    c_y = jnp.einsum('oc,bcl->bol', params['conv_cond_w'][:, :, 0], cond_p) \
        + params['conv_cond_b'][None, :, None]
    y = jnp.transpose(y + c_y, (0, 2, 1))                       # (B, L, M)

    residual = y
    mu = jnp.mean(y, axis=-1, keepdims=True)
    var = jnp.mean((y - mu) ** 2, axis=-1, keepdims=True)
    yn = (y - mu) / jnp.sqrt(var + 1e-5) * params['ln1_w'] + params['ln1_b']
    q = (yn @ params['wq'].T).reshape(B, L, n_head, d_k).transpose(0, 2, 1, 3)
    k = (yn @ params['wk'].T).reshape(B, L, n_head, d_k).transpose(0, 2, 1, 3)
    v = (yn @ params['wv'].T).reshape(B, L, n_head, d_v).transpose(0, 2, 1, 3)
    scores = jnp.einsum('bhqd,bhkd->bhqk', q / (d_k ** 0.5), k)
    scores = jnp.where(jnp.eye(L, dtype=bool)[None, None], -1e9, scores)
    attn = jax.nn.softmax(scores, axis=-1)
    ctx = jnp.einsum('bhqk,bhkd->bhqd', attn, v).transpose(0, 2, 1, 3).reshape(B, L, -1)
    h = ctx @ params['wfc'].T + residual
    mu2 = jnp.mean(h, axis=-1, keepdims=True)
    var2 = jnp.mean((h - mu2) ** 2, axis=-1, keepdims=True)
    hn = (h - mu2) / jnp.sqrt(var2 + 1e-6) * params['ln2_w'] + params['ln2_b']
    ff = jax.nn.relu(hn @ params['ffn_w1'].T + params['ffn_b1'])
    enc = ff @ params['ffn_w2'].T + params['ffn_b2'] + h        # (B, L, M)

    y2 = jnp.transpose(enc, (0, 2, 1))                          # (B, M, L)
    gate, filt = y2[:, :C], y2[:, C:]
    z = jax.nn.sigmoid(gate) * jnp.tanh(filt)
    res = jnp.einsum('dc,bcl->bdl', params['res_proj_w'][:, :, 0], z) \
        + params['res_proj_b'][None, :, None]
    skp = jnp.einsum('dc,bcl->bdl', params['skip_proj_w'][:, :, 0], z) \
        + params['skip_proj_b'][None, :, None]
    return (x + res) * _SQRT_HALF, skp, attn


if __name__ == "__main__":
    key = jax.random.PRNGKey(0)

    B, D, L = 2, 8, 16          # batch, d_model(features), d_time (sequence length)
    C = 16                      # channels  (attention d_model = 2*C = 32)
    E = 32                      # diffusion_embedding_dim
    n_head, d_k, d_v = 2, 8, 8
    d_inner = 32
    M = 2 * C

    keys = jax.random.split(key, 32)
    nrm = lambda k, s, sc=0.1: sc * jax.random.normal(k, s, dtype=jnp.float32)

    params = {
        'init_proj_w': nrm(keys[0], (C, D, 1)),   'init_proj_b': nrm(keys[1], (C,)),
        'conv_layer_w': nrm(keys[2], (M, C, 1)),  'conv_layer_b': nrm(keys[3], (M,)),
        'cond_proj_w': nrm(keys[4], (M, D, 1)),   'cond_proj_b': nrm(keys[5], (M,)),
        'conv_cond_w': nrm(keys[6], (M, M, 1)),   'conv_cond_b': nrm(keys[7], (M,)),
        'res_proj_w': nrm(keys[8], (D, C, 1)),    'res_proj_b': nrm(keys[9], (D,)),
        'skip_proj_w': nrm(keys[10], (D, C, 1)),  'skip_proj_b': nrm(keys[11], (D,)),
        'diff_proj_w': nrm(keys[12], (C, E)),     'diff_proj_b': nrm(keys[13], (C,)),
        'ln1_w': 1.0 + nrm(keys[14], (M,)),       'ln1_b': nrm(keys[15], (M,)),
        'wq': nrm(keys[16], (n_head * d_k, M)),
        'wk': nrm(keys[17], (n_head * d_k, M)),
        'wv': nrm(keys[18], (n_head * d_v, M)),
        'wfc': nrm(keys[19], (M, n_head * d_v)),
        'ln2_w': 1.0 + nrm(keys[20], (M,)),       'ln2_b': nrm(keys[21], (M,)),
        'ffn_w1': nrm(keys[22], (d_inner, M)),    'ffn_b1': nrm(keys[23], (d_inner,)),
        'ffn_w2': nrm(keys[24], (M, d_inner)),    'ffn_b2': nrm(keys[25], (M,)),
    }

    x = jax.random.normal(keys[26], (B, D, L), dtype=jnp.float32)
    cond = jax.random.normal(keys[27], (B, D, L), dtype=jnp.float32)
    diffusion_emb = jax.random.normal(keys[28], (B, E), dtype=jnp.float32)
    mask = jnp.ones((B, D, L), dtype=jnp.float32)   # unused by forward (signature parity)

    fwd = jax.jit(functools.partial(residual_encoder_layer_forward,
                                    n_head=n_head, d_k=d_k, d_v=d_v))
    out, skip, attn = jax.block_until_ready(fwd(params, x, cond, diffusion_emb, mask))

    ref_out, ref_skip, ref_attn = _reference_forward(
        params, x, cond, diffusion_emb, n_head=n_head, d_k=d_k, d_v=d_v)

    assert out.shape == (B, D, L) and skip.shape == (B, D, L), (out.shape, skip.shape)
    assert attn.shape == (B, n_head, L, L), attn.shape
    assert jnp.allclose(out, ref_out, atol=1e-3, rtol=1e-3), "residual output mismatch"
    assert jnp.allclose(skip, ref_skip, atol=1e-3, rtol=1e-3), "skip output mismatch"
    assert jnp.allclose(attn, ref_attn, atol=1e-3, rtol=1e-3), "attention weights mismatch"

    print("KERNEL_OK")
</pallas_src>

<mosaic_0001>
module attributes {stable_mosaic.version = 11 : i64} {
  func.func @kernel(%arg0: i32, %arg1: memref<1x8x16xf32, #tpu.memory_space<vmem>>, %arg2: memref<1x8x16xf32, #tpu.memory_space<vmem>>, %arg3: memref<1x1x32xf32, #tpu.memory_space<vmem>>, %arg4: memref<8x32xf32, #tpu.memory_space<vmem>>, %arg5: memref<8x32xf32, #tpu.memory_space<vmem>>, %arg6: memref<32x32xf32, #tpu.memory_space<vmem>>, %arg7: memref<1x32xf32, #tpu.memory_space<vmem>>, %arg8: memref<1x32xf32, #tpu.memory_space<vmem>>, %arg9: memref<1x32xf32, #tpu.memory_space<vmem>>, %arg10: memref<32x16xf32, #tpu.memory_space<vmem>>, %arg11: memref<32x16xf32, #tpu.memory_space<vmem>>, %arg12: memref<32x16xf32, #tpu.memory_space<vmem>>, %arg13: memref<16x32xf32, #tpu.memory_space<vmem>>, %arg14: memref<1x32xf32, #tpu.memory_space<vmem>>, %arg15: memref<1x32xf32, #tpu.memory_space<vmem>>, %arg16: memref<32x32xf32, #tpu.memory_space<vmem>>, %arg17: memref<1x32xf32, #tpu.memory_space<vmem>>, %arg18: memref<32x32xf32, #tpu.memory_space<vmem>>, %arg19: memref<1x32xf32, #tpu.memory_space<vmem>>, %arg20: memref<16x16xf32, #tpu.memory_space<vmem>>, %arg21: memref<16x1xf32, #tpu.memory_space<vmem>>, %arg22: memref<1x8x16xf32, #tpu.memory_space<vmem>>, %arg23: memref<1x8x16xf32, #tpu.memory_space<vmem>>, %arg24: memref<1x2x16x16xf32, #tpu.memory_space<vmem>>, %arg25: memref<16x16xf32, #tpu.memory_space<vmem>>) attributes {dimension_semantics = [#tpu.dimension_semantics<parallel>], iteration_bounds = array<i64: 2>, scalar_prefetch = 0 : i64, scratch_operands = 1 : i64, tpu.core_type = #tpu.core_type<tc>, window_params = [{transform_indices = @transform_0, window_bounds = array<i64: 1, 8, 16>}, {transform_indices = @transform_1, window_bounds = array<i64: 1, 8, 16>}, {transform_indices = @transform_2, window_bounds = array<i64: 1, 1, 32>}, {pipeline_mode = #tpu.pipeline_mode<synchronous>, transform_indices = @transform_3, window_bounds = array<i64: 8, 32>}, {pipeline_mode = #tpu.pipeline_mode<synchronous>, transform_indices = @transform_4, window_bounds = array<i64: 8, 32>}, {pipeline_mode = #tpu.pipeline_mode<synchronous>, transform_indices = @transform_5, window_bounds = array<i64: 32, 32>}, {pipeline_mode = #tpu.pipeline_mode<synchronous>, transform_indices = @transform_6, window_bounds = array<i64: 1, 32>}, {pipeline_mode = #tpu.pipeline_mode<synchronous>, transform_indices = @transform_7, window_bounds = array<i64: 1, 32>}, {pipeline_mode = #tpu.pipeline_mode<synchronous>, transform_indices = @transform_8, window_bounds = array<i64: 1, 32>}, {pipeline_mode = #tpu.pipeline_mode<synchronous>, transform_indices = @transform_9, window_bounds = array<i64: 32, 16>}, {pipeline_mode = #tpu.pipeline_mode<synchronous>, transform_indices = @transform_10, window_bounds = array<i64: 32, 16>}, {pipeline_mode = #tpu.pipeline_mode<synchronous>, transform_indices = @transform_11, window_bounds = array<i64: 32, 16>}, {pipeline_mode = #tpu.pipeline_mode<synchronous>, transform_indices = @transform_12, window_bounds = array<i64: 16, 32>}, {pipeline_mode = #tpu.pipeline_mode<synchronous>, transform_indices = @transform_13, window_bounds = array<i64: 1, 32>}, {pipeline_mode = #tpu.pipeline_mode<synchronous>, transform_indices = @transform_14, window_bounds = array<i64: 1, 32>}, {pipeline_mode = #tpu.pipeline_mode<synchronous>, transform_indices = @transform_15, window_bounds = array<i64: 32, 32>}, {pipeline_mode = #tpu.pipeline_mode<synchronous>, transform_indices = @transform_16, window_bounds = array<i64: 1, 32>}, {pipeline_mode = #tpu.pipeline_mode<synchronous>, transform_indices = @transform_17, window_bounds = array<i64: 32, 32>}, {pipeline_mode = #tpu.pipeline_mode<synchronous>, transform_indices = @transform_18, window_bounds = array<i64: 1, 32>}, {pipeline_mode = #tpu.pipeline_mode<synchronous>, transform_indices = @transform_19, window_bounds = array<i64: 16, 16>}, {pipeline_mode = #tpu.pipeline_mode<synchronous>, transform_indices = @transform_20, window_bounds = array<i64: 16, 1>}, {transform_indices = @transform_21, window_bounds = array<i64: 1, 8, 16>}, {transform_indices = @transform_22, window_bounds = array<i64: 1, 8, 16>}, {transform_indices = @transform_23, window_bounds = array<i64: 1, 2, 16, 16>}]} {
    %c0 = arith.constant 0 : index
    %c0_0 = arith.constant 0 : index
    %c0_1 = arith.constant 0 : index
    %0 = vector.load %arg1[%c0, %c0_0, %c0_1] : memref<1x8x16xf32, #tpu.memory_space<vmem>>, vector<1x8x16xf32>
    %1 = vector.shape_cast %0 : vector<1x8x16xf32> to vector<8x16xf32>
    %c0_2 = arith.constant 0 : index
    %c0_3 = arith.constant 0 : index
    %c0_4 = arith.constant 0 : index
    %2 = vector.load %arg2[%c0_2, %c0_3, %c0_4] : memref<1x8x16xf32, #tpu.memory_space<vmem>>, vector<1x8x16xf32>
    %3 = vector.shape_cast %2 : vector<1x8x16xf32> to vector<8x16xf32>
    %4 = tpu.transpose %1, [1, 0] : vector<8x16xf32> -> vector<16x8xf32>
    %5 = tpu.transpose %3, [1, 0] : vector<8x16xf32> -> vector<16x8xf32>
    %c0_5 = arith.constant 0 : index
    %c0_6 = arith.constant 0 : index
    %c0_7 = arith.constant 0 : index
    %6 = vector.load %arg3[%c0_5, %c0_6, %c0_7] : memref<1x1x32xf32, #tpu.memory_space<vmem>>, vector<1x1x32xf32>
    %7 = vector.shape_cast %6 : vector<1x1x32xf32> to vector<1x32xf32>
    %c0_8 = arith.constant 0 : index
    %c0_9 = arith.constant 0 : index
    %8 = vector.load %arg6[%c0_8, %c0_9] : memref<32x32xf32, #tpu.memory_space<vmem>>, vector<32x32xf32>
    %cst = arith.constant dense<0.000000e+00> : vector<1x32xf32>
    %9 = tpu.matmul %7, %8, %cst {dimension_numbers = #tpu.dot_dimension_numbers<[1], [0], [0], [1], [0, 0, 1, 1], [], []>} : vector<1x32xf32>, vector<32x32xf32>, vector<1x32xf32> -> vector<1x32xf32>
    %c0_10 = arith.constant 0 : index
    %c0_11 = arith.constant 0 : index
    %10 = vector.load %arg4[%c0_10, %c0_11] : memref<8x32xf32, #tpu.memory_space<vmem>>, vector<8x32xf32>
    %cst_12 = arith.constant dense<0.000000e+00> : vector<16x32xf32>
    %11 = tpu.matmul %4, %10, %cst_12 {dimension_numbers = #tpu.dot_dimension_numbers<[1], [0], [0], [1], [0, 0, 1, 1], [], []>} : vector<16x8xf32>, vector<8x32xf32>, vector<16x32xf32> -> vector<16x32xf32>
    %c0_13 = arith.constant 0 : index
    %c0_14 = arith.constant 0 : index
    %12 = vector.load %arg5[%c0_13, %c0_14] : memref<8x32xf32, #tpu.memory_space<vmem>>, vector<8x32xf32>
    %cst_15 = arith.constant dense<0.000000e+00> : vector<16x32xf32>
    %13 = tpu.matmul %5, %12, %cst_15 {dimension_numbers = #tpu.dot_dimension_numbers<[1], [0], [0], [1], [0, 0, 1, 1], [], []>} : vector<16x8xf32>, vector<8x32xf32>, vector<16x32xf32> -> vector<16x32xf32>
    %14 = arith.addf %11, %13 : vector<16x32xf32>
    %15 = vector.broadcast %9 : vector<1x32xf32> to vector<16x32xf32>
    %16 = arith.addf %14, %15 : vector<16x32xf32>
    %c0_16 = arith.constant 0 : index
    %c0_17 = arith.constant 0 : index
    %17 = vector.load %arg7[%c0_16, %c0_17] : memref<1x32xf32, #tpu.memory_space<vmem>>, vector<1x32xf32>
    %18 = vector.broadcast %17 : vector<1x32xf32> to vector<16x32xf32>
    %19 = arith.addf %16, %18 : vector<16x32xf32>
    %cst_18 = arith.constant dense<0.000000e+00> : vector<16xf32>
    %20 = vector.multi_reduction <add>, %19, %cst_18 [1] : vector<16x32xf32> to vector<16xf32>
    %21 = vector.shape_cast %20 : vector<16xf32> to vector<16x1xf32>
    %cst_19 = arith.constant 3.200000e+01 : f32
    %22 = vector.broadcast %cst_19 : f32 to vector<16x1xf32>
    %23 = arith.divf %21, %22 : vector<16x1xf32>
    %24 = vector.broadcast %23 : vector<16x1xf32> to vector<16x32xf32>
    %25 = arith.subf %19, %24 : vector<16x32xf32>
    %26 = arith.mulf %25, %25 : vector<16x32xf32>
    %cst_20 = arith.constant dense<0.000000e+00> : vector<16xf32>
    %27 = vector.multi_reduction <add>, %26, %cst_20 [1] : vector<16x32xf32> to vector<16xf32>
    %28 = vector.shape_cast %27 : vector<16xf32> to vector<16x1xf32>
    %cst_21 = arith.constant 3.200000e+01 : f32
    %29 = vector.broadcast %cst_21 : f32 to vector<16x1xf32>
    %30 = arith.divf %28, %29 : vector<16x1xf32>
    %31 = vector.broadcast %23 : vector<16x1xf32> to vector<16x32xf32>
    %32 = arith.subf %19, %31 : vector<16x32xf32>
    %cst_22 = arith.constant 9.99999974E-6 : f32
    %33 = vector.broadcast %cst_22 : f32 to vector<16x1xf32>
    %34 = arith.addf %30, %33 : vector<16x1xf32>
    %35 = math.rsqrt %34 : vector<16x1xf32>
    %36 = vector.broadcast %35 : vector<16x1xf32> to vector<16x32xf32>
    %37 = arith.mulf %32, %36 : vector<16x32xf32>
    %c0_23 = arith.constant 0 : index
    %c0_24 = arith.constant 0 : index
    %38 = vector.load %arg8[%c0_23, %c0_24] : memref<1x32xf32, #tpu.memory_space<vmem>>, vector<1x32xf32>
    %39 = vector.broadcast %38 : vector<1x32xf32> to vector<16x32xf32>
    %40 = arith.mulf %37, %39 : vector<16x32xf32>
    %c0_25 = arith.constant 0 : index
    %c0_26 = arith.constant 0 : index
    %41 = vector.load %arg9[%c0_25, %c0_26] : memref<1x32xf32, #tpu.memory_space<vmem>>, vector<1x32xf32>
    %42 = vector.broadcast %41 : vector<1x32xf32> to vector<16x32xf32>
    %43 = arith.addf %40, %42 : vector<16x32xf32>
    %c0_27 = arith.constant 0 : index
    %c0_28 = arith.constant 0 : index
    %44 = vector.load %arg10[%c0_27, %c0_28] : memref<32x16xf32, #tpu.memory_space<vmem>>, vector<32x16xf32>
    %cst_29 = arith.constant dense<0.000000e+00> : vector<16x16xf32>
    %45 = tpu.matmul %43, %44, %cst_29 {dimension_numbers = #tpu.dot_dimension_numbers<[1], [0], [0], [1], [0, 0, 1, 1], [], []>} : vector<16x32xf32>, vector<32x16xf32>, vector<16x16xf32> -> vector<16x16xf32>
    %c0_30 = arith.constant 0 : index
    %c0_31 = arith.constant 0 : index
    %46 = vector.load %arg11[%c0_30, %c0_31] : memref<32x16xf32, #tpu.memory_space<vmem>>, vector<32x16xf32>
    %cst_32 = arith.constant dense<0.000000e+00> : vector<16x16xf32>
    %47 = tpu.matmul %43, %46, %cst_32 {dimension_numbers = #tpu.dot_dimension_numbers<[1], [0], [0], [1], [0, 0, 1, 1], [], []>} : vector<16x32xf32>, vector<32x16xf32>, vector<16x16xf32> -> vector<16x16xf32>
    %c0_33 = arith.constant 0 : index
    %c0_34 = arith.constant 0 : index
    %48 = vector.load %arg12[%c0_33, %c0_34] : memref<32x16xf32, #tpu.memory_space<vmem>>, vector<32x16xf32>
    %cst_35 = arith.constant dense<0.000000e+00> : vector<16x16xf32>
    %49 = tpu.matmul %43, %48, %cst_35 {dimension_numbers = #tpu.dot_dimension_numbers<[1], [0], [0], [1], [0, 0, 1, 1], [], []>} : vector<16x32xf32>, vector<32x16xf32>, vector<16x16xf32> -> vector<16x16xf32>
    %50 = tpu.iota {dimensions = array<i32: 0>} : vector<16x16xi32>
    %51 = tpu.iota {dimensions = array<i32: 1>} : vector<16x16xi32>
    %52 = arith.cmpi eq, %50, %51 : vector<16x16xi32>
    %53 = vector.extract_strided_slice %45 {offsets = [0, 0], sizes = [16, 8], strides = [1, 1]} : vector<16x16xf32> to vector<16x8xf32>
    %cst_36 = arith.constant 0.353553385 : f32
    %54 = vector.broadcast %cst_36 : f32 to vector<16x8xf32>
    %55 = arith.mulf %53, %54 : vector<16x8xf32>
    %56 = vector.extract_strided_slice %47 {offsets = [0, 0], sizes = [16, 8], strides = [1, 1]} : vector<16x16xf32> to vector<16x8xf32>
    %57 = vector.extract_strided_slice %49 {offsets = [0, 0], sizes = [16, 8], strides = [1, 1]} : vector<16x16xf32> to vector<16x8xf32>
    %cst_37 = arith.constant dense<0.000000e+00> : vector<16x16xf32>
    %58 = tpu.matmul %55, %56, %cst_37 {dimension_numbers = #tpu.dot_dimension_numbers<[1], [1], [0], [0], [0, 0, 1, 0], [], []>} : vector<16x8xf32>, vector<16x8xf32>, vector<16x16xf32> -> vector<16x16xf32>
    %cst_38 = arith.constant -1.000000e+09 : f32
    %59 = vector.broadcast %cst_38 : f32 to vector<16x16xf32>
    %60 = arith.select %52, %59, %58 : vector<16x16xi1>, vector<16x16xf32>
    %cst_39 = arith.constant dense<0xFF800000> : vector<16xf32>
    %61 = vector.multi_reduction <maximumf>, %60, %cst_39 [1] : vector<16x16xf32> to vector<16xf32>
    %62 = vector.shape_cast %61 : vector<16xf32> to vector<16x1xf32>
    %63 = vector.broadcast %62 : vector<16x1xf32> to vector<16x16xf32>
    %64 = arith.subf %60, %63 : vector<16x16xf32>
    %65 = math.exp %64 : vector<16x16xf32>
    %cst_40 = arith.constant dense<0.000000e+00> : vector<16xf32>
    %66 = vector.multi_reduction <add>, %65, %cst_40 [1] : vector<16x16xf32> to vector<16xf32>
    %67 = vector.shape_cast %66 : vector<16xf32> to vector<16x1xf32>
    %68 = tpu.reciprocal %67 {approx = true} : vector<16x1xf32> -> vector<16x1xf32>
    %69 = arith.mulf %67, %68 : vector<16x1xf32>
    %cst_41 = arith.constant 2.000000e+00 : f32
    %70 = vector.broadcast %cst_41 : f32 to vector<16x1xf32>
    %71 = arith.subf %70, %69 : vector<16x1xf32>
    %72 = arith.mulf %68, %71 : vector<16x1xf32>
    %73 = vector.broadcast %72 : vector<16x1xf32> to vector<16x16xf32>
    %74 = arith.mulf %65, %73 : vector<16x16xf32>
    %c0_42 = arith.constant 0 : index
    %c0_43 = arith.constant 0 : index
    %c0_44 = arith.constant 0 : index
    %c0_45 = arith.constant 0 : index
    %75 = vector.load %arg24[%c0_42, %c0_43, %c0_44, %c0_45] : memref<1x2x16x16xf32, #tpu.memory_space<vmem>>, vector<1x1x16x16xf32>
    %76 = vector.shape_cast %75 : vector<1x1x16x16xf32> to vector<16x16xf32>
    %77 = vector.shape_cast %74 : vector<16x16xf32> to vector<1x1x16x16xf32>
    tpu.vector_store %arg24[%c0_42, %c0_43, %c0_44, %c0_45], %77 {strides = array<i32>} : memref<1x2x16x16xf32, #tpu.memory_space<vmem>>, vector<1x1x16x16xf32>,
    %cst_46 = arith.constant dense<0.000000e+00> : vector<16x8xf32>
    %78 = tpu.matmul %74, %57, %cst_46 {dimension_numbers = #tpu.dot_dimension_numbers<[1], [0], [0], [1], [0, 0, 1, 1], [], []>} : vector<16x16xf32>, vector<16x8xf32>, vector<16x8xf32> -> vector<16x8xf32>
    %c0_47 = arith.constant 0 : index
    %c0_48 = arith.constant 0 : index
    %79 = vector.load %arg25[%c0_47, %c0_48] : memref<16x16xf32, #tpu.memory_space<vmem>>, vector<16x8xf32>
    tpu.vector_store %arg25[%c0_47, %c0_48], %78 {strides = array<i32>} : memref<16x16xf32, #tpu.memory_space<vmem>>, vector<16x8xf32>,
    %80 = vector.extract_strided_slice %45 {offsets = [0, 8], sizes = [16, 8], strides = [1, 1]} : vector<16x16xf32> to vector<16x8xf32>
    %cst_49 = arith.constant 0.353553385 : f32
    %81 = vector.broadcast %cst_49 : f32 to vector<16x8xf32>
    %82 = arith.mulf %80, %81 : vector<16x8xf32>
    %83 = vector.extract_strided_slice %47 {offsets = [0, 8], sizes = [16, 8], strides = [1, 1]} : vector<16x16xf32> to vector<16x8xf32>
    %84 = vector.extract_strided_slice %49 {offsets = [0, 8], sizes = [16, 8], strides = [1, 1]} : vector<16x16xf32> to vector<16x8xf32>
    %cst_50 = arith.constant dense<0.000000e+00> : vector<16x16xf32>
    %85 = tpu.matmul %82, %83, %cst_50 {dimension_numbers = #tpu.dot_dimension_numbers<[1], [1], [0], [0], [0, 0, 1, 0], [], []>} : vector<16x8xf32>, vector<16x8xf32>, vector<16x16xf32> -> vector<16x16xf32>
    %cst_51 = arith.constant -1.000000e+09 : f32
    %86 = vector.broadcast %cst_51 : f32 to vector<16x16xf32>
    %87 = arith.select %52, %86, %85 : vector<16x16xi1>, vector<16x16xf32>
    %cst_52 = arith.constant dense<0xFF800000> : vector<16xf32>
    %88 = vector.multi_reduction <maximumf>, %87, %cst_52 [1] : vector<16x16xf32> to vector<16xf32>
    %89 = vector.shape_cast %88 : vector<16xf32> to vector<16x1xf32>
    %90 = vector.broadcast %89 : vector<16x1xf32> to vector<16x16xf32>
    %91 = arith.subf %87, %90 : vector<16x16xf32>
    %92 = math.exp %91 : vector<16x16xf32>
    %cst_53 = arith.constant dense<0.000000e+00> : vector<16xf32>
    %93 = vector.multi_reduction <add>, %92, %cst_53 [1] : vector<16x16xf32> to vector<16xf32>
    %94 = vector.shape_cast %93 : vector<16xf32> to vector<16x1xf32>
    %95 = tpu.reciprocal %94 {approx = true} : vector<16x1xf32> -> vector<16x1xf32>
    %96 = arith.mulf %94, %95 : vector<16x1xf32>
    %cst_54 = arith.constant 2.000000e+00 : f32
    %97 = vector.broadcast %cst_54 : f32 to vector<16x1xf32>
    %98 = arith.subf %97, %96 : vector<16x1xf32>
    %99 = arith.mulf %95, %98 : vector<16x1xf32>
    %100 = vector.broadcast %99 : vector<16x1xf32> to vector<16x16xf32>
    %101 = arith.mulf %92, %100 : vector<16x16xf32>
    %c0_55 = arith.constant 0 : index
    %c1 = arith.constant 1 : index
    %c0_56 = arith.constant 0 : index
    %c0_57 = arith.constant 0 : index
    %102 = vector.load %arg24[%c0_55, %c1, %c0_56, %c0_57] : memref<1x2x16x16xf32, #tpu.memory_space<vmem>>, vector<1x1x16x16xf32>
    %103 = vector.shape_cast %102 : vector<1x1x16x16xf32> to vector<16x16xf32>
    %104 = vector.shape_cast %101 : vector<16x16xf32> to vector<1x1x16x16xf32>
    tpu.vector_store %arg24[%c0_55, %c1, %c0_56, %c0_57], %104 {strides = array<i32>} : memref<1x2x16x16xf32, #tpu.memory_space<vmem>>, vector<1x1x16x16xf32>,
    %cst_58 = arith.constant dense<0.000000e+00> : vector<16x8xf32>
    %105 = tpu.matmul %101, %84, %cst_58 {dimension_numbers = #tpu.dot_dimension_numbers<[1], [0], [0], [1], [0, 0, 1, 1], [], []>} : vector<16x16xf32>, vector<16x8xf32>, vector<16x8xf32> -> vector<16x8xf32>
    %c0_59 = arith.constant 0 : index
    %c8 = arith.constant 8 : index
    %106 = vector.load %arg25[%c0_59, %c8] : memref<16x16xf32, #tpu.memory_space<vmem>>, vector<16x8xf32>
    tpu.vector_store %arg25[%c0_59, %c8], %105 {strides = array<i32>} : memref<16x16xf32, #tpu.memory_space<vmem>>, vector<16x8xf32>,
    %c0_60 = arith.constant 0 : index
    %c0_61 = arith.constant 0 : index
    %107 = vector.load %arg25[%c0_60, %c0_61] : memref<16x16xf32, #tpu.memory_space<vmem>>, vector<16x16xf32>
    %c0_62 = arith.constant 0 : index
    %c0_63 = arith.constant 0 : index
    %108 = vector.load %arg13[%c0_62, %c0_63] : memref<16x32xf32, #tpu.memory_space<vmem>>, vector<16x32xf32>
    %cst_64 = arith.constant dense<0.000000e+00> : vector<16x32xf32>
    %109 = tpu.matmul %107, %108, %cst_64 {dimension_numbers = #tpu.dot_dimension_numbers<[1], [0], [0], [1], [0, 0, 1, 1], [], []>} : vector<16x16xf32>, vector<16x32xf32>, vector<16x32xf32> -> vector<16x32xf32>
    %110 = arith.addf %109, %19 : vector<16x32xf32>
    %cst_65 = arith.constant dense<0.000000e+00> : vector<16xf32>
    %111 = vector.multi_reduction <add>, %110, %cst_65 [1] : vector<16x32xf32> to vector<16xf32>
    %112 = vector.shape_cast %111 : vector<16xf32> to vector<16x1xf32>
    %cst_66 = arith.constant 3.200000e+01 : f32
    %113 = vector.broadcast %cst_66 : f32 to vector<16x1xf32>
    %114 = arith.divf %112, %113 : vector<16x1xf32>
    %115 = vector.broadcast %114 : vector<16x1xf32> to vector<16x32xf32>
    %116 = arith.subf %110, %115 : vector<16x32xf32>
    %117 = arith.mulf %116, %116 : vector<16x32xf32>
    %cst_67 = arith.constant dense<0.000000e+00> : vector<16xf32>
    %118 = vector.multi_reduction <add>, %117, %cst_67 [1] : vector<16x32xf32> to vector<16xf32>
    %119 = vector.shape_cast %118 : vector<16xf32> to vector<16x1xf32>
    %cst_68 = arith.constant 3.200000e+01 : f32
    %120 = vector.broadcast %cst_68 : f32 to vector<16x1xf32>
    %121 = arith.divf %119, %120 : vector<16x1xf32>
    %122 = vector.broadcast %114 : vector<16x1xf32> to vector<16x32xf32>
    %123 = arith.subf %110, %122 : vector<16x32xf32>
    %cst_69 = arith.constant 9.99999997E-7 : f32
    %124 = vector.broadcast %cst_69 : f32 to vector<16x1xf32>
    %125 = arith.addf %121, %124 : vector<16x1xf32>
    %126 = math.rsqrt %125 : vector<16x1xf32>
    %127 = vector.broadcast %126 : vector<16x1xf32> to vector<16x32xf32>
    %128 = arith.mulf %123, %127 : vector<16x32xf32>
    %c0_70 = arith.constant 0 : index
    %c0_71 = arith.constant 0 : index
    %129 = vector.load %arg14[%c0_70, %c0_71] : memref<1x32xf32, #tpu.memory_space<vmem>>, vector<1x32xf32>
    %130 = vector.broadcast %129 : vector<1x32xf32> to vector<16x32xf32>
    %131 = arith.mulf %128, %130 : vector<16x32xf32>
    %c0_72 = arith.constant 0 : index
    %c0_73 = arith.constant 0 : index
    %132 = vector.load %arg15[%c0_72, %c0_73] : memref<1x32xf32, #tpu.memory_space<vmem>>, vector<1x32xf32>
    %133 = vector.broadcast %132 : vector<1x32xf32> to vector<16x32xf32>
    %134 = arith.addf %131, %133 : vector<16x32xf32>
    %c0_74 = arith.constant 0 : index
    %c0_75 = arith.constant 0 : index
    %135 = vector.load %arg16[%c0_74, %c0_75] : memref<32x32xf32, #tpu.memory_space<vmem>>, vector<32x32xf32>
    %cst_76 = arith.constant dense<0.000000e+00> : vector<16x32xf32>
    %136 = tpu.matmul %134, %135, %cst_76 {dimension_numbers = #tpu.dot_dimension_numbers<[1], [0], [0], [1], [0, 0, 1, 1], [], []>} : vector<16x32xf32>, vector<32x32xf32>, vector<16x32xf32> -> vector<16x32xf32>
    %c0_77 = arith.constant 0 : index
    %c0_78 = arith.constant 0 : index
    %137 = vector.load %arg17[%c0_77, %c0_78] : memref<1x32xf32, #tpu.memory_space<vmem>>, vector<1x32xf32>
    %138 = vector.broadcast %137 : vector<1x32xf32> to vector<16x32xf32>
    %139 = arith.addf %136, %138 : vector<16x32xf32>
    %cst_79 = arith.constant 0.000000e+00 : f32
    %140 = vector.broadcast %cst_79 : f32 to vector<16x32xf32>
    %141 = arith.maximumf %139, %140 : vector<16x32xf32>
    %c0_80 = arith.constant 0 : index
    %c0_81 = arith.constant 0 : index
    %142 = vector.load %arg18[%c0_80, %c0_81] : memref<32x32xf32, #tpu.memory_space<vmem>>, vector<32x32xf32>
    %cst_82 = arith.constant dense<0.000000e+00> : vector<16x32xf32>
    %143 = tpu.matmul %141, %142, %cst_82 {dimension_numbers = #tpu.dot_dimension_numbers<[1], [0], [0], [1], [0, 0, 1, 1], [], []>} : vector<16x32xf32>, vector<32x32xf32>, vector<16x32xf32> -> vector<16x32xf32>
    %c0_83 = arith.constant 0 : index
    %c0_84 = arith.constant 0 : index
    %144 = vector.load %arg19[%c0_83, %c0_84] : memref<1x32xf32, #tpu.memory_space<vmem>>, vector<1x32xf32>
    %145 = vector.broadcast %144 : vector<1x32xf32> to vector<16x32xf32>
    %146 = arith.addf %143, %145 : vector<16x32xf32>
    %147 = arith.addf %146, %110 : vector<16x32xf32>
    %148 = tpu.transpose %147, [1, 0] : vector<16x32xf32> -> vector<32x16xf32>
    %149 = vector.extract_strided_slice %148 {offsets = [0, 0], sizes = [16, 16], strides = [1, 1]} : vector<32x16xf32> to vector<16x16xf32>
    %150 = vector.extract_strided_slice %148 {offsets = [16, 0], sizes = [16, 16], strides = [1, 1]} : vector<32x16xf32> to vector<16x16xf32>
    %151 = arith.negf %149 : vector<16x16xf32>
    %152 = math.exp %151 : vector<16x16xf32>
    %cst_85 = arith.constant 1.000000e+00 : f32
    %153 = vector.broadcast %cst_85 : f32 to vector<16x16xf32>
    %154 = arith.addf %153, %152 : vector<16x16xf32>
    %155 = arith.divf %153, %154 : vector<16x16xf32>
    %156 = math.tanh %150 : vector<16x16xf32>
    %157 = arith.mulf %155, %156 : vector<16x16xf32>
    %c0_86 = arith.constant 0 : index
    %c0_87 = arith.constant 0 : index
    %158 = vector.load %arg20[%c0_86, %c0_87] : memref<16x16xf32, #tpu.memory_space<vmem>>, vector<16x16xf32>
    %cst_88 = arith.constant dense<0.000000e+00> : vector<16x16xf32>
    %159 = tpu.matmul %158, %157, %cst_88 {dimension_numbers = #tpu.dot_dimension_numbers<[1], [0], [0], [1], [0, 0, 1, 1], [], []>} : vector<16x16xf32>, vector<16x16xf32>, vector<16x16xf32> -> vector<16x16xf32>
    %c0_89 = arith.constant 0 : index
    %c0_90 = arith.constant 0 : index
    %160 = vector.load %arg21[%c0_89, %c0_90] : memref<16x1xf32, #tpu.memory_space<vmem>>, vector<16x1xf32>
    %161 = vector.broadcast %160 : vector<16x1xf32> to vector<16x16xf32>
    %162 = arith.addf %159, %161 : vector<16x16xf32>
    %163 = vector.extract_strided_slice %162 {offsets = [0, 0], sizes = [8, 16], strides = [1, 1]} : vector<16x16xf32> to vector<8x16xf32>
    %164 = arith.addf %1, %163 : vector<8x16xf32>
    %cst_91 = arith.constant 0.707106769 : f32
    %165 = vector.broadcast %cst_91 : f32 to vector<8x16xf32>
    %166 = arith.mulf %164, %165 : vector<8x16xf32>
    %c0_92 = arith.constant 0 : index
    %c0_93 = arith.constant 0 : index
    %c0_94 = arith.constant 0 : index
    %167 = vector.load %arg22[%c0_92, %c0_93, %c0_94] : memref<1x8x16xf32, #tpu.memory_space<vmem>>, vector<1x8x16xf32>
    %168 = vector.shape_cast %167 : vector<1x8x16xf32> to vector<8x16xf32>
    %169 = vector.shape_cast %166 : vector<8x16xf32> to vector<1x8x16xf32>
    tpu.vector_store %arg22[%c0_92, %c0_93, %c0_94], %169 {strides = array<i32>} : memref<1x8x16xf32, #tpu.memory_space<vmem>>, vector<1x8x16xf32>,
    %170 = vector.extract_strided_slice %162 {offsets = [8, 0], sizes = [8, 16], strides = [1, 1]} : vector<16x16xf32> to vector<8x16xf32>
    %c0_95 = arith.constant 0 : index
    %c0_96 = arith.constant 0 : index
    %c0_97 = arith.constant 0 : index
    %171 = vector.load %arg23[%c0_95, %c0_96, %c0_97] : memref<1x8x16xf32, #tpu.memory_space<vmem>>, vector<1x8x16xf32>
    %172 = vector.shape_cast %171 : vector<1x8x16xf32> to vector<8x16xf32>
    %173 = vector.shape_cast %170 : vector<8x16xf32> to vector<1x8x16xf32>
    tpu.vector_store %arg23[%c0_95, %c0_96, %c0_97], %173 {strides = array<i32>} : memref<1x8x16xf32, #tpu.memory_space<vmem>>, vector<1x8x16xf32>,
    return
  }
  func.func @transform_0(%arg0: i32) -> (i32, i32, i32) {
    %c0_i32 = arith.constant 0 : i32
    %c0_i32_0 = arith.constant 0 : i32
    %c0_i32_1 = arith.constant 0 : i32
    return %arg0, %c0_i32, %c0_i32_0 : i32, i32, i32
  }
  func.func @transform_1(%arg0: i32) -> (i32, i32, i32) {
    %c0_i32 = arith.constant 0 : i32
    %c0_i32_0 = arith.constant 0 : i32
    %c0_i32_1 = arith.constant 0 : i32
    return %arg0, %c0_i32, %c0_i32_0 : i32, i32, i32
  }
  func.func @transform_2(%arg0: i32) -> (i32, i32, i32) {
    %c0_i32 = arith.constant 0 : i32
    %c0_i32_0 = arith.constant 0 : i32
    %c0_i32_1 = arith.constant 0 : i32
    return %arg0, %c0_i32, %c0_i32_0 : i32, i32, i32
  }
  func.func @transform_3(%arg0: i32) -> (i32, i32) {
    %c0_i32 = arith.constant 0 : i32
    %c0_i32_0 = arith.constant 0 : i32
    %c0_i32_1 = arith.constant 0 : i32
    return %c0_i32, %c0_i32_0 : i32, i32
  }
  func.func @transform_4(%arg0: i32) -> (i32, i32) {
    %c0_i32 = arith.constant 0 : i32
    %c0_i32_0 = arith.constant 0 : i32
    %c0_i32_1 = arith.constant 0 : i32
    return %c0_i32, %c0_i32_0 : i32, i32
  }
  func.func @transform_5(%arg0: i32) -> (i32, i32) {
    %c0_i32 = arith.constant 0 : i32
    %c0_i32_0 = arith.constant 0 : i32
    %c0_i32_1 = arith.constant 0 : i32
    return %c0_i32, %c0_i32_0 : i32, i32
  }
  func.func @transform_6(%arg0: i32) -> (i32, i32) {
    %c0_i32 = arith.constant 0 : i32
    %c0_i32_0 = arith.constant 0 : i32
    %c0_i32_1 = arith.constant 0 : i32
    return %c0_i32, %c0_i32_0 : i32, i32
  }
  func.func @transform_7(%arg0: i32) -> (i32, i32) {
    %c0_i32 = arith.constant 0 : i32
    %c0_i32_0 = arith.constant 0 : i32
    %c0_i32_1 = arith.constant 0 : i32
    return %c0_i32, %c0_i32_0 : i32, i32
  }
  func.func @transform_8(%arg0: i32) -> (i32, i32) {
    %c0_i32 = arith.constant 0 : i32
    %c0_i32_0 = arith.constant 0 : i32
    %c0_i32_1 = arith.constant 0 : i32
    return %c0_i32, %c0_i32_0 : i32, i32
  }
  func.func @transform_9(%arg0: i32) -> (i32, i32) {
    %c0_i32 = arith.constant 0 : i32
    %c0_i32_0 = arith.constant 0 : i32
    %c0_i32_1 = arith.constant 0 : i32
    return %c0_i32, %c0_i32_0 : i32, i32
  }
  func.func @transform_10(%arg0: i32) -> (i32, i32) {
    %c0_i32 = arith.constant 0 : i32
    %c0_i32_0 = arith.constant 0 : i32
    %c0_i32_1 = arith.constant 0 : i32
    return %c0_i32, %c0_i32_0 : i32, i32
  }
  func.func @transform_11(%arg0: i32) -> (i32, i32) {
    %c0_i32 = arith.constant 0 : i32
    %c0_i32_0 = arith.constant 0 : i32
    %c0_i32_1 = arith.constant 0 : i32
    return %c0_i32, %c0_i32_0 : i32, i32
  }
  func.func @transform_12(%arg0: i32) -> (i32, i32) {
    %c0_i32 = arith.constant 0 : i32
    %c0_i32_0 = arith.constant 0 : i32
    %c0_i32_1 = arith.constant 0 : i32
    return %c0_i32, %c0_i32_0 : i32, i32
  }
  func.func @transform_13(%arg0: i32) -> (i32, i32) {
    %c0_i32 = arith.constant 0 : i32
    %c0_i32_0 = arith.constant 0 : i32
    %c0_i32_1 = arith.constant 0 : i32
    return %c0_i32, %c0_i32_0 : i32, i32
  }
  func.func @transform_14(%arg0: i32) -> (i32, i32) {
    %c0_i32 = arith.constant 0 : i32
    %c0_i32_0 = arith.constant 0 : i32
    %c0_i32_1 = arith.constant 0 : i32
    return %c0_i32, %c0_i32_0 : i32, i32
  }
  func.func @transform_15(%arg0: i32) -> (i32, i32) {
    %c0_i32 = arith.constant 0 : i32
    %c0_i32_0 = arith.constant 0 : i32
    %c0_i32_1 = arith.constant 0 : i32
    return %c0_i32, %c0_i32_0 : i32, i32
  }
  func.func @transform_16(%arg0: i32) -> (i32, i32) {
    %c0_i32 = arith.constant 0 : i32
    %c0_i32_0 = arith.constant 0 : i32
    %c0_i32_1 = arith.constant 0 : i32
    return %c0_i32, %c0_i32_0 : i32, i32
  }
  func.func @transform_17(%arg0: i32) -> (i32, i32) {
    %c0_i32 = arith.constant 0 : i32
    %c0_i32_0 = arith.constant 0 : i32
    %c0_i32_1 = arith.constant 0 : i32
    return %c0_i32, %c0_i32_0 : i32, i32
  }
  func.func @transform_18(%arg0: i32) -> (i32, i32) {
    %c0_i32 = arith.constant 0 : i32
    %c0_i32_0 = arith.constant 0 : i32
    %c0_i32_1 = arith.constant 0 : i32
    return %c0_i32, %c0_i32_0 : i32, i32
  }
  func.func @transform_19(%arg0: i32) -> (i32, i32) {
    %c0_i32 = arith.constant 0 : i32
    %c0_i32_0 = arith.constant 0 : i32
    %c0_i32_1 = arith.constant 0 : i32
    return %c0_i32, %c0_i32_0 : i32, i32
  }
  func.func @transform_20(%arg0: i32) -> (i32, i32) {
    %c0_i32 = arith.constant 0 : i32
    %c0_i32_0 = arith.constant 0 : i32
    %c0_i32_1 = arith.constant 0 : i32
    return %c0_i32, %c0_i32_0 : i32, i32
  }
  func.func @transform_21(%arg0: i32) -> (i32, i32, i32) {
    %c0_i32 = arith.constant 0 : i32
    %c0_i32_0 = arith.constant 0 : i32
    %c0_i32_1 = arith.constant 0 : i32
    return %arg0, %c0_i32, %c0_i32_0 : i32, i32, i32
  }
  func.func @transform_22(%arg0: i32) -> (i32, i32, i32) {
    %c0_i32 = arith.constant 0 : i32
    %c0_i32_0 = arith.constant 0 : i32
    %c0_i32_1 = arith.constant 0 : i32
    return %arg0, %c0_i32, %c0_i32_0 : i32, i32, i32
  }
  func.func @transform_23(%arg0: i32) -> (i32, i32, i32, i32) {
    %c0_i32 = arith.constant 0 : i32
    %c0_i32_0 = arith.constant 0 : i32
    %c0_i32_1 = arith.constant 0 : i32
    %c0_i32_2 = arith.constant 0 : i32
    return %arg0, %c0_i32, %c0_i32_0, %c0_i32_1 : i32, i32, i32, i32
  }
}

</mosaic_0001>

<bundles_post_ra>
// kernel: residual_encoder_layer_forward.1
= control target key start
LH: loop header
LB: loop body
LE: loop exit
PB: predicated region body
PF: predicated region fallthrough
CT: control target
= control target key end

     0   :  { %s2582_s0 = inlined_call_operand.vmem [shape: f32[2,8,16], index: 0, kind: input, shape index: {}]   ;;  %s2583_s1 = inlined_call_operand.vmem [shape: f32[2,8,16], index: 1, kind: input, shape index: {}]   ;;  %s2584_s2 = inlined_call_operand.vmem [shape: f32[2,1,32], index: 2, kind: input, shape index: {}]   ;;  %s2585_s3 = inlined_call_operand.vmem [shape: f32[8,32], index: 3, kind: input, shape index: {}]   ;;  %s2586_s4 = inlined_call_operand.vmem [shape: f32[8,32], index: 4, kind: input, shape index: {}]   ;;  %s2587_s5 = inlined_call_operand.vmem [shape: f32[32,32], index: 5, kind: input, shape index: {}]   ;;  %s2588_s6 = inlined_call_operand.vmem [shape: f32[1,32], index: 6, kind: input, shape index: {}]   ;;  %s2589_s7 = inlined_call_operand.vmem [shape: f32[1,32], index: 7, kind: input, shape index: {}]   ;;  %s2590_s8 = inlined_call_operand.vmem [shape: f32[1,32], index: 8, kind: input, shape index: {}]   ;;  %s2591_s9 = inlined_call_operand.vmem [shape: f32[32,16], index: 9, kind: input, shape index: {}]   ;;  %s2592_s10 = inlined_call_operand.vmem [shape: f32[32,16], index: 10, kind: input, shape index: {}]   ;;  %s2593_s11 = inlined_call_operand.vmem [shape: f32[32,16], index: 11, kind: input, shape index: {}]   ;;  %s2594_s12 = inlined_call_operand.vmem [shape: f32[16,32], index: 12, kind: input, shape index: {}]   ;;  %s2595_s13 = inlined_call_operand.vmem [shape: f32[1,32], index: 13, kind: input, shape index: {}]   ;;  %s2596_s14 = inlined_call_operand.vmem [shape: f32[1,32], index: 14, kind: input, shape index: {}]   ;;  %s2597_s15 = inlined_call_operand.vmem [shape: f32[32,32], index: 15, kind: input, shape index: {}]   ;;  %s2598_s16 = inlined_call_operand.vmem [shape: f32[1,32], index: 16, kind: input, shape index: {}]   ;;  %s2599_s17 = inlined_call_operand.vmem [shape: f32[32,32], index: 17, kind: input, shape index: {}]   ;;  %s2600_s18 = inlined_call_operand.vmem [shape: f32[1,32], index: 18, kind: input, shape index: {}]   ;;  %s2601_s19 = inlined_call_operand.vmem [shape: f32[16,16], index: 19, kind: input, shape index: {}]   ;;  %s2602_s20 = inlined_call_operand.vmem [shape: f32[16,1], index: 20, kind: input, shape index: {}]   ;;  %s2603_s21 = inlined_call_operand.hbm [shape: f32[2,8,16], index: 21, kind: output, shape index: {0}]   ;;  %s2604_s22 = inlined_call_operand.hbm [shape: f32[2,8,16], index: 22, kind: output, shape index: {1}]   ;;  %s2605_s23 = inlined_call_operand.hbm [shape: f32[2,2,16,16], index: 23, kind: output, shape index: {2}]  }
   0x1   :  { %2622 = sst [smem:[#allocation17_spill]] %s2582_s0 }
   0x2   :  { %2623 = sst [smem:[#allocation18_spill]] %s2583_s1 }
   0x3   :  { %2624 = sst [smem:[#allocation19_spill]] %s2584_s2 }
   0x4   :  { %2625 = sst [smem:[#allocation20_spill]] %s2585_s3 }
   0x5   :  { %2626 = sst [smem:[#allocation21_spill]] %s2586_s4 }
   0x6   :  { %2627 = sst [smem:[#allocation22_spill]] %s2587_s5 }
   0x7   :  { %2628 = sst [smem:[#allocation23_spill]] %s2588_s6 }
   0x8   :  { %2629 = sst [smem:[#allocation24_spill]] %s2589_s7 }
   0x9   :  { %2630 = sst [smem:[#allocation25_spill]] %s2590_s8 }
   0xa   :  { %2631 = sst [smem:[#allocation26_spill]] %s2591_s9 }
   0xb   :  { %2632 = sst [smem:[#allocation27_spill]] %s2592_s10 }
   0xc   :  { %2633 = sst [smem:[#allocation28_spill]] %s2593_s11 }
   0xd   :  { %2634 = sst [smem:[#allocation29_spill]] %s2594_s12 }
   0xe   :  { %2635 = sst [smem:[#allocation30_spill]] %s2595_s13 }
   0xf   :  { %2636 = sst [smem:[#allocation31_spill]] %s2603_s21 }
  0x10   :  { %2637 = sst [smem:[#allocation32_spill]] %s2604_s22 }
  0x11   :  { %2638 = sst [smem:[#allocation33_spill]] %s2605_s23 }
  0x12   :  { %29 = vsyncpa [#allocation4], 0 }
  0x13   :  { %31 = vsyncpa [#allocation4 + $0x1], 0 }
  0x14   :  { %32 = vsyncpa [#allocation6], 0 }
  0x15   :  { %34 = vsyncpa [#allocation6 + $0x1], 0  ;;  %s2197_s4 = smov 0   ;;  %s2199_s30 = smov 0  }
  0x16   :  { %s2201_s24 = smov 0   ;;  %s2203_s25 = smov 0  }
  0x17 LB: > { %2639 = sst [smem:[#allocation10_spill]] %s2058_s4  ;;  %s2218_s5 = sadd.s32 4294967295, %s2070_s25   ;;  %s2070_s25 = sphi %s2203_s25, %s2672_s25   ;;  %s2066_s24 = sphi %s2201_s24, %s2674_s24   ;;  %s2062_s30 = sphi %s2199_s30, %s2676_s30   ;;  %s2058_s4 = sphi %s2197_s4, %s2675_s4  }
  0x18   : > { %2640 = sst [smem:[#allocation11_spill]] %s2066_s24  ;;  %s2607_s1 = sadd.s32 4294967294, %s2070_s25  }
  0x19   : > { %2641 = sst [smem:[#allocation12_spill]] %s2070_s25  ;;  %s2222_s26 = sadd.s32 1, %s2070_s25  }
  0x1a   : > { %2642 = sst [smem:[#allocation13_spill]] %s2222_s26  ;;  %s503_s2 = sadd.s32 1, %s2066_s24 }
  0x1b   : > { %s500_s6 = ssub.s32 %s2070_s25, %s2222_s26  ;;  %p513_p0 = scmp.ne.s32.totalorder %s2066_s24, %s2062_s30 }
  0x1c   : > { %p501_p1 = scmp.eq.s32.totalorder %s500_s6, 0  ;;  %p514_p2 = scmp.eq.s32.totalorder %s2218_s5, 1 }
  0x1d   : > { %p519_p3 = scmp.ne.s32.totalorder %s2062_s30, %s2058_s4  ;;  %p520_p4 = scmp.eq.s32.totalorder %s2607_s1, 1 }
  0x1e   : > { %s2235_s27 = scalar_select %p501_p1, %s2066_s24, %s503_s2  }
  0x1f   : > { %p2237_p5 = por %p514_p2, %p513_p0  ;;  %p2241_p6 = por %p520_p4, %p519_p3 }
  0x20   : > { %2643 = sst [smem:[#allocation14_spill]] %s2235_s27  ;;  %p1789_p7 = scmp.ge.s32.totalorder %s2070_s25, 1 }
  0x21   : > { %s2644_s7 = scalar_select %p2237_p5, 1, 0 }
  0x22   : > { %s2646_s28 = scalar_select %p2241_p6, 1, 0 }
  0x23   : > { %2645 = sst [smem:[#allocation15_spill]] %s2644_s7  ;;  %p664_p8 = scmp.lt.s32.totalorder %s2070_s25, 3 }
  0x24   : > { %2647 = sst [smem:[#allocation16_spill]] %s2646_s28 }
  0x25   : > { %p665_p9 = pnand %p1789_p7, %p664_p8 }
  0x26   : > { %p744_p10 = scmp.lt.s32.totalorder (!%p665_p9), %s2218_s5, 1  ;;  %s2648_s0 = sld [smem:[#allocation21_spill]] (!%p665_p9) }
  0x27   : > { %668 = sbr.rel (%p665_p9) target bundleno = 2577 (0xa11), region = 104  ;;  %s2649_s24 = sld [smem:[#allocation18_spill]] (!%p665_p9) }
  0x28   : > { %s2650_s25 = sld [smem:[#allocation17_spill]] (!%p665_p9)  ;;  %s2620_s1 = smov (!%p665_p9), 8  }
  0x29   : > { %s2652_s21 = sld [smem:[#allocation20_spill]] (!%p665_p9) }
  0x2a   : > { %s2654_s23 = sld [smem:[#allocation23_spill]] (!%p665_p9) }
  0x2b   : > { %s2655_s9 = sld [smem:[#allocation26_spill]] (!%p665_p9) }
  0x2c   : > { %v851_v0 = vld [vmem:[%s2648_s0] sm:$0xff]  ;;  %s745_s2 = scalar_select %p744_p10, %s2218_s5, 1  ;;  %vm826_vm0 = vcmask 261120   ;;  %vm852_vm1 = vcmask 64512   ;;  %v2072_v28 = vmov 32.0   ;;  %vm1116_vm10 = vcmask 130048  }
  0x2d   : > { %874 = vmatpush.msra.mxu1 %v851_v0  ;;  %1840 = vmatpush.msra.mxu2 %v851_v0  ;;  %s2651_s0 = sld [smem:[#allocation22_spill]]  ;;  %1910 = vrcp.f32 %v2072_v28  ;;  %vm1295_vm12 = vcmask 130112  }
  0x2e   : > { %s1793_s6 = sshll.u32 %s745_s2, 3  ;;  %s2656_s10 = sld [smem:[#allocation27_spill]] }
  0x2f   : > { %s751_s26 = scalar_lea.vmem %s2649_s24, %s1793_s6  ;;  %s747_s7 = scalar_lea.vmem %s2650_s25, %s1793_s6  ;;  %v850_v4 = vld [vmem:[%s2652_s21] sm:$0xff] }
  0x30   : > { %v756_v1 = vld [vmem:[%s751_s26] sm:$0xff]  ;;  %903 = vmatpush.msrb.mxu2 %v850_v4  ;;  %s2657_s11 = sld [smem:[#allocation28_spill]]  ;;  %s1833_s25 = sshll.u32 %s2218_s5, 3 }
  0x31   : > { %789 = vxpose.xlu0.b32.start.end [1/1] (short) (narrow) %v756_v1, 16  ;;  %v2258_v2 = vld [vmem:[%s747_s7] sm:$0xff]  ;;  %s2653_s7 = sld [smem:[#allocation19_spill]]  ;;  %v986_v45 = vld [vmem:[%s2655_s9 + $0x18] sm:$0xff]  ;;  %v985_v48 = vld [vmem:[%s2655_s9 + $0x10] sm:$0xff] }
  0x32   : > { %v1903_v19 = vld [vmem:[%s2654_s23] ss:$0 sm:$0xff]  ;;  %1005 = vmatpush.msra.mxu3 %v986_v45  ;;  %v984_v51 = vld [vmem:[%s2655_s9 + $0x8] sm:$0xff]  ;;  %s2658_s29 = sld [smem:[#allocation24_spill]]  ;;  %s2073_s23 = smov 120  }
  0x33   : > { %v825_v3 = vld [vmem:[%s2651_s0 + $0x18] sm:$0xff]  ;;  %v824_v5 = vld [vmem:[%s2651_s0 + $0x10] sm:$0xff]  ;;  %v823_v6 = vld [vmem:[%s2651_s0 + $0x8] sm:$0xff]  ;;  %v1911_v29 = vpop.eup %1910  ;;  %s2659_s8 = sld [smem:[#allocation25_spill]] }
  0x34   : > { %842 = vmatpush.msra.mxu0 %v825_v3  ;;  %v822_v7 = vld [vmem:[%s2651_s0] sm:$0xff]  ;;  %v927_v30 = vmul.f32 32.0, %v1911_v29  ;;  %vm931_vm2 = vweird.f32 %v1911_v29  ;;  %v1019_v46 = vld [vmem:[%s2656_s10 + $0x18] sm:$0xff]  ;;  %v1018_v49 = vld [vmem:[%s2656_s10 + $0x10] sm:$0xff]  ;;  %1006 = vmatpush.msra.mxu3 %v985_v48  ;;  %s2660_s12 = sld [smem:[#allocation29_spill]] }
  0x35   : > { %v1017_v52 = vld [vmem:[%s2656_s10 + $0x8] sm:$0xff]  ;;  %v983_v54 = vld [vmem:[%s2655_s9] sm:$0xff]  ;;  %s2661_s13 = sld [smem:[#allocation30_spill]] }
  0x36   : > { %843 = vmatpush.msra.mxu0 %v824_v5  ;;  %v928_v31 = vsub.f32 1.0, %v927_v30  ;;  %v1046_v47 = vld [vmem:[%s2657_s11 + $0x18] sm:$0xff]  ;;  %v1045_v50 = vld [vmem:[%s2657_s11 + $0x10] sm:$0xff]  ;;  %v1044_v53 = vld [vmem:[%s2657_s11 + $0x8] sm:$0xff]  ;;  %1007 = vmatpush.msra.mxu3 %v984_v51  ;;  %s2663_s22 = sld [smem:[#allocation32_spill]] }
  0x37   : > { %s754_s28 = scalar_lea.vmem %s2653_s7, %s745_s2  ;;  %1059 = vmatpush.msrb.mxu1 %v1046_v47  ;;  %v1016_v55 = vld [vmem:[%s2656_s10] sm:$0xff]  ;;  %s2388_s2 = sand.u32 1, %s2062_s30  }
  0x38   : > { %844 = vmatpush.msra.mxu0 %v823_v6  ;;  %v821_v8 = vld [vmem:[%s754_s28] sm:$0x1]  ;;  %v929_v32 = vmul.f32 %v1911_v29, %v928_v31  ;;  %1008 = vmatpush.msra.mxu3 %v983_v54  ;;  %s1792_s3 = sshll.u32 %s2388_s2, 5  ;;  %s1790_s4 = sshll.u32 %s2388_s2, 3 }
  0x39   : > { %1060 = vmatpush.msrb.mxu1 %v1045_v50  ;;  %v1043_v56 = vld [vmem:[%s2657_s11] sm:$0xff]  ;;  %s2391_s24 = scalar_lea.vmem [#allocation7], %s1792_s3  ;;  %s2662_s7 = sld [smem:[#allocation31_spill]] }
  0x3a   : > { %845 = vmatpush.msra.mxu0 %v822_v7  ;;  %v930_v33 = vadd.f32 %v1911_v29, %v929_v32  ;;  %s729_s3 = scalar_lea.vmem [#allocation3], %s1790_s4  ;;  %s2504_s9 = scalar_lea.vmem [#allocation5], %s1790_s4 }
  0x3b   : > { %1795 = vmatmul.msk.f32.vlgmr.msra.gmra.mxu0 %vm826_vm0, %v821_v8  ;;  %1061 = vmatpush.msrb.mxu1 %v1044_v53  ;;  %v1904_v8 = vld [vmem:[%s2658_s29] ss:$0 sm:$0xff]  ;;  %s1609_s0 = sshll.u32 %s729_s3, 4  ;;  %s1623_s26 = sshll.u32 %s2504_s9, 4  ;;  %s1610_s0 = int_to_ptr.vmem [resolvable:$true] %s1609_s0  ;;  %s2512_s26 = int_to_ptr.vmem [resolvable:$true] %s1623_s26 }
  0x3c   : > { %v2295_v34 = vsel %vm931_vm2, %v1911_v29, %v930_v33  ;;  %1032 = vmatpush.msrb.mxu0 %v1019_v46  ;;  %s2664_s10 = sld [smem:[#allocation33_spill]]  ;;  %s1637_s29 = sshll.u32 %s2391_s24, 4  ;;  %s2526_s29 = int_to_ptr.vmem [resolvable:$true] %s1637_s29 }
  0x3d   : > { %1062 = vmatpush.msrb.mxu1 %v1043_v56  ;;  %s1587_s4 = scalar_lea.sflag [#allocation4], %s2388_s2 }
  0x3e   : > { %1033 = vmatpush.msrb.mxu0 %v1018_v49 }
  0x3f   : > { %s1607_s28 = scalar_lea.hbm %s2662_s7, %s1833_s25  ;;  %s1968_s27 = scalar_lea.hbm %s2662_s7, 16 }
  0x40   : > { %1034 = vmatpush.msrb.mxu0 %v1017_v52 }
  0x41   : > { %757 = vxpose.xlu0.b32.start.end [1/1] (short) (narrow) %v2258_v2, 16 }
  0x42   : > { %1035 = vmatpush.msrb.mxu0 %v1016_v55 }
  0xb8   : > { %v847_v14 = vpop.f32.mrf.mxu0 }
  0xb9   : > { %v911_v15 = vperm.slane %v847_v14, 0 }
  0xd5   : > { %v805_v9 = vpop.trf.xlu0 }
  0xd6   : > { %1796 = vmatmul.msk.f32.vlgmr.msra.gmra.mxu1 %vm852_vm1, %v805_v9 }
  0xdd   : > { %v806_v10 = vpop.trf.xlu0 }
  0xde   : > { %1797 = vmatmul.msk.f32.vlgmr.msra.gmra.mxu2 %vm852_vm1, %v806_v10 }
  0xe5   : > { %v773_v11 = vpop.trf.xlu0 }
  0xe6   : > { %1798 = vmatmul.msk.f32.vlgmr.msrb.gmra.mxu2 %vm852_vm1, %v773_v11 }
  0xed   : > { %v774_v12 = vpop.trf.xlu0 }
  0xee   : > { %1799 = vmatmul.msk.f32.gmra.mxu2 %vm852_vm1, %v774_v12  ;;  %v1905_v12 = vld [vmem:[%s2659_s8] ss:$0 sm:$0xff]  ;;  %s1611_s8 = sshll.u32 %s1607_s28, 4  ;;  %s1612_s8 = int_to_ptr.hbm [resolvable:$true] %s1611_s8 }
  0xef   : > { %s1962_s21 = sshra.s32 %s1612_s8, 4  ;;  %s1963_s21 = int_to_ptr.hbm [resolvable:$true] %s1962_s21 }
  0xf0   : > { %p1969_p0 = scmp.lt.s32.totalorder %s1963_s21, %s2662_s7 }
 0x153   : > { %v876_v16 = vpop.f32.mrf.mxu1 }
 0x161   : > { %v879_v13 = vpop.f32.mrf.mxu2 }
 0x169   : > { %v905_v17 = vpop.f32.mrf.mxu2 }
 0x16a   : > { %v906_v18 = vadd.f32 %v905_v17, %v876_v16 }
 0x16c   : > { %v912_v20 = vadd.f32 %v911_v15, %v906_v18 }
 0x16e   : > { %v2287_v21 = vadd.f32 %v1903_v19, %v912_v20 }
 0x170   : > { %v920_v22 = vsel %vm826_vm0, %v2287_v21, 0.0 }
 0x171   : > { %921 = vadd.xlane.f32.xlu1 %v920_v22  ;;  %v908_v23 = vpop.f32.mrf.mxu2 }
 0x172   : > { %v909_v24 = vadd.f32 %v908_v23, %v879_v13 }
 0x174   : > { %v913_v25 = vadd.f32 %v911_v15, %v909_v24 }
 0x176   : > { %v2291_v26 = vadd.f32 %v1903_v19, %v913_v25 }
 0x178   : > { %v923_v27 = vsel %vm826_vm0, %v2291_v26, 0.0 }
 0x179   : > { %924 = vadd.xlane.f32.xlu1 %v923_v27 }
 0x1e4   : > { %v922_v35 = vpop.xlane.xlu1 %921 }
 0x1e5   : > { %v933_v36 = vmul.f32 %v2295_v34, %v922_v35 }
 0x1e7   : > { %v935_v37 = vsub.f32 %v2287_v21, %v933_v36 }
 0x1e9   : > { %v937_v38 = vmul.f32 %v935_v37, %v935_v37 }
 0x1eb   : > { %v939_v39 = vsel %vm826_vm0, %v937_v38, 0.0 }
 0x1ec   : > { %940 = vadd.xlane.f32.xlu2 %v939_v39  ;;  %v925_v40 = vpop.xlane.xlu1 %924 }
 0x1ed   : > { %v934_v41 = vmul.f32 %v2295_v34, %v925_v40 }
 0x1ef   : > { %v2302_v42 = vsub.f32 %v2291_v26, %v934_v41 }
 0x1f1   : > { %v938_v43 = vmul.f32 %v2302_v42, %v2302_v42 }
 0x1f3   : > { %v942_v44 = vsel %vm826_vm0, %v938_v43, 0.0 }
 0x1f4   : > { %943 = vadd.xlane.f32.xlu2 %v942_v44 }
 0x25f   : > { %v941_v57 = vpop.xlane.xlu2 %940 }
 0x260   : > { %v945_v58 = vmul.f32 %v941_v57, %v2295_v34 }
 0x262   : > { %v947_v59 = vadd.f32 1e-05, %v945_v58 }
 0x264   : > { %1912 = vrsqrt.f32 %v947_v59  ;;  %vm955_vm4 = vweird.f32 %v947_v59 }
 0x267   : > { %v944_v60 = vpop.xlane.xlu2 %943 }
 0x268   : > { %v946_v61 = vmul.f32 %v944_v60, %v2295_v34 }
 0x26a   : > { %v1913_v62 = vpop.eup %1912  ;;  %v948_v63 = vadd.f32 1e-05, %v946_v61 }
 0x26b   : > { %v950_v0 = vmul.f32 %v1913_v62, %v947_v59  ;;  %vm956_vm3 = vweird.f32 %v1913_v62 }
 0x26c   : > { %1914 = vrsqrt.f32 %v948_v63  ;;  %vm957_vm5 = vmor %vm955_vm4, %vm956_vm3  ;;  %vm965_vm7 = vweird.f32 %v948_v63 }
 0x26d   : > { %v951_v1 = vmul.f32 %v1913_v62, %v950_v0 }
 0x26f   : > { %v952_v3 = vmul.f32 0.5, %v951_v1 }
 0x271   : > { %v953_v4 = vsub.f32 1.5, %v952_v3 }
 0x272   : > { %v1915_v5 = vpop.eup %1914 }
 0x273   : > { %v954_v6 = vmul.f32 %v1913_v62, %v953_v4  ;;  %v960_v7 = vmul.f32 %v1915_v5, %v948_v63  ;;  %vm966_vm6 = vweird.f32 %v1915_v5 }
 0x274   : > { %vm967_vm8 = vmor %vm965_vm7, %vm966_vm6 }
 0x275   : > { %v958_v9 = vsel %vm957_vm5, %v1913_v62, %v954_v6  ;;  %v961_v10 = vmul.f32 %v1915_v5, %v960_v7 }
 0x276   : > { %v969_v11 = vmul.f32 %v958_v9, %v935_v37  ;;  %v1070_v37 = vlaneseq }
 0x277   : > { %v962_v13 = vmul.f32 0.5, %v961_v10 }
 0x278   : > { %v975_v14 = vmul.f32 %v1904_v8, %v969_v11  ;;  %v1071_v38 = vshrl.u32 %v1070_v37, 7  ;;  %v1074_v39 = vand.u32 127, %v1070_v37 }
 0x279   : > { %v963_v15 = vsub.f32 1.5, %v962_v13 }
 0x27a   : > { %v981_v16 = vadd.f32 %v1905_v12, %v975_v14  ;;  %vm1075_vm9 = vcmp.eq.s32.totalorder %v1071_v38, %v1074_v39  ;;  %v1072_v44 = vadd.s32 8, %v1071_v38 }
 0x27b   : > { %v964_v17 = vmul.f32 %v1915_v5, %v963_v15 }
 0x27c   : > { %1800 = vmatmul.msk.f32.vlgmr.msra.gmra.mxu3 %vm826_vm0, %v981_v16  ;;  %1802 = vmatmul.msk.f32.vlgmr.msrb.gmra.mxu0 %vm826_vm0, %v981_v16  ;;  %vm1076_vm11 = vcmp.eq.s32.totalorder %v1072_v44, %v1074_v39 }
 0x27d   : > { %v968_v18 = vsel %vm967_vm8, %v1915_v5, %v964_v17  ;;  %1804 = vmatmul.msk.f32.vlgmr.msrb.gmra.mxu1 %vm826_vm0, %v981_v16 }
 0x27e   : > { %v970_v19 = vmul.f32 %v968_v18, %v2302_v42 }
 0x280   : > { %v976_v20 = vmul.f32 %v1904_v8, %v970_v19 }
 0x282   : > { %v982_v22 = vadd.f32 %v1905_v12, %v976_v20 }
 0x284   : > { %1801 = vmatmul.msk.f32.gmra.mxu3 %vm826_vm0, %v982_v22  ;;  %1803 = vmatmul.msk.f32.gmra.mxu0 %vm826_vm0, %v982_v22 }
 0x285   : > { %1805 = vmatmul.msk.f32.gmra.mxu1 %vm826_vm0, %v982_v22 }
 0x2f9   : > { %v1037_v23 = vpop.f32.mrf.mxu0 }
 0x2fa   : > { %v2358_v24 = vpop.f32.mrf.mxu1  ;;  %1182 = vrot.lane.b32.xlu2 %v1037_v23, %s2073_s23 }
 0x2ff   : > { %v1010_v25 = vpop.f32.mrf.mxu3 }
 0x300   : > { %v1077_v27 = vmul.f32 0.35355338, %v1010_v25 }
 0x301   : > { %v1040_v28 = vpop.f32.mrf.mxu0 }
 0x302   : > { %v2361_v29 = vpop.f32.mrf.mxu1  ;;  %1178 = vrot.lane.b32.xlu0 %v1077_v27, %s2073_s23  ;;  %1184 = vrot.lane.b32.xlu1 %v1040_v28, %s2073_s23 }
 0x303   : > { %1167 = vmatpush.msrb.mxu3 %v2361_v29  ;;  %1806 = vmatpush.xpose.msk.msra.mxu2 %vm852_vm1, %v1040_v28  ;;  %v1896_v9 = vpack.i.bf16 %v2358_v24, %v2361_v29 }
 0x305   : > { %1168 = vmatpush.msrb.mxu3 %v2358_v24 }
 0x307   : > { %1807 = vmatpush.xpose.msk.msra.mxu2 %vm852_vm1, %v1037_v23  ;;  %v1013_v30 = vpop.f32.mrf.mxu3 }
 0x308   : > { %v1078_v31 = vmul.f32 0.35355338, %v1013_v30 }
 0x30a   : > { %1808 = vmatmul.msk.f32.vlgmr.msra.gmra.mxu2 %vm852_vm1, %v1077_v27  ;;  %1180 = vrot.lane.b32.xlu2 %v1078_v31, %s2073_s23 }
 0x312   : > { %1809 = vmatmul.msk.f32.gmra.mxu2 %vm852_vm1, %v1078_v31 }
 0x354   : > { %v1183_v33 = vpop.permute.xlu2 %1182 }
 0x364   : > { %v1181_v36 = vpop.permute.xlu2 %1180 }
 0x374   : > { %v1185_v32 = vpop.permute.xlu1 %1184  ;;  %v1179_v35 = vpop.permute.xlu0 %1178 }
 0x375   : > { %1812 = vmatpush.xpose.msk.msra.mxu0 %vm852_vm1, %v1185_v32 }
 0x379   : > { %1813 = vmatpush.xpose.msk.msra.mxu0 %vm852_vm1, %v1183_v33 }
 0x37c   : > { %1814 = vmatmul.msk.f32.vlgmr.msra.gmra.mxu0 %vm852_vm1, %v1179_v35 }
 0x384   : > { %1815 = vmatmul.msk.f32.gmra.mxu0 %vm852_vm1, %v1181_v36 }
 0x38d   : > { %v1108_v42 = vpop.f32.mrf.mxu2 }
 0x38e   : > { %v1114_v45 = vsel %vm1075_vm9, -1e+09, %v1108_v42 }
 0x38f   : > { %v1117_v48 = vsel %vm1116_vm10, %v1114_v45, -inf }
 0x395   : > { %v1111_v50 = vpop.f32.mrf.mxu2 }
 0x396   : > { %v1115_v51 = vsel %vm1076_vm11, -1e+09, %v1111_v50 }
 0x397   : > { %v1120_v52 = vsel %vm1116_vm10, %v1115_v51, -inf }
 0x3f9   : > { %v1211_v40 = vpop.f32.mrf.mxu0 }
 0x3fa   : > { %v1217_v41 = vsel %vm1075_vm9, -1e+09, %v1211_v40 }
 0x3fb   : > { %v1219_v43 = vsel %vm1116_vm10, %v1217_v41, -inf }
 0x3fc   : > { %1220 = vmax.xlane.f32.xlu1 %v1219_v43 }
 0x401   : > { %v1214_v46 = vpop.f32.mrf.mxu0 }
 0x402   : > { %v1218_v47 = vsel %vm1076_vm11, -1e+09, %v1214_v46  ;;  %v1300_v46 = vld [vmem:[%s2660_s12] sm:$0xff] }
 0x403   : > { %v1222_v49 = vsel %vm1116_vm10, %v1218_v47, -inf }
 0x404   : > { %1118 = vmax.xlane.f32.xlu1 %v1117_v48  ;;  %1223 = vmax.xlane.f32.xlu2 %v1222_v49 }
 0x40c   : > { %1121 = vmax.xlane.f32.xlu2 %v1120_v52 }
 0x46f   : > { %v1221_v53 = vpop.xlane.xlu1 %1220 }
 0x470   : > { %v1225_v54 = vsub.f32 %v1217_v41, %v1221_v53 }
 0x472   : > { %v1227_v55 = vmul.f32 1.442695, %v1225_v54 }
 0x474   : > { %1916 = vpow2.f32 %v1227_v55 }
 0x477   : > { %v1224_v56 = vpop.xlane.xlu2 %1223  ;;  %v1119_v57 = vpop.xlane.xlu1 %1118 }
 0x478   : > { %v1226_v58 = vsub.f32 %v1218_v47, %v1224_v56  ;;  %v1123_v61 = vsub.f32 %v1114_v45, %v1119_v57  ;;  %v1301_v45 = vld [vmem:[%s2660_s12 + $0x8] sm:$0xff] }
 0x479   : > { %1322 = vmatpush.msrb.mxu2 %v1301_v45 }
 0x47a   : > { %v1917_v59 = vpop.eup %1916  ;;  %v1229_v60 = vmul.f32 1.442695, %v1226_v58  ;;  %v1125_v63 = vmul.f32 1.442695, %v1123_v61 }
 0x47b   : > { %v1231_v62 = vsel %vm1116_vm10, %v1917_v59, 0.0  ;;  %1323 = vmatpush.msrb.mxu2 %v1300_v46 }
 0x47c   : > { %1232 = vadd.xlane.f32.xlu1 %v1231_v62  ;;  %1918 = vpow2.f32 %v1229_v60 }
 0x47d   : > { %1920 = vpow2.f32 %v1125_v63 }
 0x47f   : > { %v1122_v0 = vpop.xlane.xlu2 %1121 }
 0x480   : > { %v1124_v3 = vsub.f32 %v1115_v51, %v1122_v0 }
 0x482   : > { %v1919_v1 = vpop.eup %1918  ;;  %v1127_v5 = vmul.f32 1.442695, %v1124_v3  ;;  %v1389_v3 = vld [vmem:[%s2597_s15 + $0x10] sm:$0xff] }
 0x483   : > { %v1234_v4 = vsel %vm1116_vm10, %v1919_v1, 0.0  ;;  %v1921_v6 = vpop.eup %1920 }
 0x484   : > { %1235 = vadd.xlane.f32.xlu2 %v1234_v4  ;;  %1922 = vpow2.f32 %v1127_v5  ;;  %v1129_v7 = vsel %vm1116_vm10, %v1921_v6, 0.0  ;;  %v1388_v4 = vld [vmem:[%s2597_s15 + $0x8] sm:$0xff]  ;;  %v1387_v5 = vld [vmem:[%s2597_s15] sm:$0xff] }
 0x48a   : > { %v1923_v8 = vpop.eup %1922 }
 0x48b   : > { %v1132_v10 = vsel %vm1116_vm10, %v1923_v8, 0.0 }
 0x48c   : > { %1130 = vadd.xlane.f32.xlu2 %v1129_v7 }
 0x494   : > { %1133 = vadd.xlane.f32.xlu2 %v1132_v10 }
 0x495   : > { %1897 = vrot.lane.b32.xlu1 %v1896_v9, %s2073_s23  ;;  %s1839_s23 = sshll.u32 %s2218_s5, 5 }
 0x496   : > { %s1636_s11 = scalar_lea.hbm %s2664_s10, %s1839_s23 }
 0x497   : > { %s1639_s28 = sshll.u32 %s1636_s11, 4  ;;  %s2528_s28 = int_to_ptr.hbm [resolvable:$true] %s1639_s28 }
 0x4ef   : > { %v1233_v11 = vpop.xlane.xlu1 %1232 }
 0x4f0   : > { %1924 = vrcp.f32 %v1233_v11 }
 0x4f6   : > { %v1925_v12 = vpop.eup %1924 }
 0x4f7   : > { %v1239_v13 = vmul.f32 %v1925_v12, %v1233_v11  ;;  %v1236_v14 = vpop.xlane.xlu2 %1235 }
 0x4f8   : > { %1926 = vrcp.f32 %v1236_v14 }
 0x4f9   : > { %v1241_v15 = vsub.f32 2.0, %v1239_v13 }
 0x4fb   : > { %v1243_v16 = vmul.f32 %v1925_v12, %v1241_v15  ;;  %v1906_v15 = vld [vmem:[%s2661_s13] ss:$0 sm:$0xff]  ;;  %s1964_s13 = scalar_lea.hbm %s1963_s21, 8 }
 0x4fc   : > { %p1965_p11 = scmp.ne.s32.totalorder %s1963_s21, %s1964_s13  ;;  %p1970_p1 = scmp.lt.s32.totalorder %s1968_s27, %s1964_s13 }
 0x4fd   : > { %v1245_v17 = vmul.f32 %v1917_v59, %v1243_v16 }
 0x4fe   : > { %v1927_v18 = vpop.eup %1926  ;;  %p1966_p12 = pnand %p1965_p11, %p2237_p5  ;;  %p1971_p2 = por %p1970_p1, %p1969_p0 }
 0x4ff   : > { %1816 = vst.msk [vmem:[%s2391_s24 + $0x10] sm:$0xff] %vm1116_vm10, %v1245_v17  ;;  %v1240_v19 = vmul.f32 %v1927_v18, %v1236_v14  ;;  %v1131_v20 = vpop.xlane.xlu2 %1130 }
 0x500   : > { %1928 = vrcp.f32 %v1131_v20  ;;  %p1967_p13 = pneg %p1966_p12 }
 0x501   : > { %v1242_v22 = vsub.f32 2.0, %v1240_v19 }
 0x502   : > { %p1972_p3 = pnand %p1971_p2, %p1967_p13 }
 0x503   : > { %v1244_v23 = vmul.f32 %v1927_v18, %v1242_v22  ;;  %v1907_v18 = vld [vmem:[%s2596_s14] ss:$0 sm:$0xff]  ;;  %v1429_v22 = vld [vmem:[%s2599_s17 + $0x18] sm:$0xff] }
 0x504   : > { %1452 = vmatpush.msrb.mxu0 %v1429_v22 }
 0x505   : > { %v1246_v24 = vmul.f32 %v1919_v1, %v1244_v23  ;;  %v1390_v1 = vld [vmem:[%s2597_s15 + $0x18] sm:$0xff] }
 0x506   : > { %v1929_v25 = vpop.eup %1928  ;;  %1413 = vmatpush.msra.mxu3 %v1390_v1  ;;  %v2075_v1 = vmov 0  }
 0x507   : > { %v1898_v27 = vpop.permute.xlu1 %1897  ;;  %v1137_v28 = vmul.f32 %v1929_v25, %v1131_v20  ;;  %v1134_v30 = vpop.xlane.xlu2 %1133  ;;  %1817 = vst.msk [vmem:[%s2391_s24 + $0x18] sm:$0xff] %vm1116_vm10, %v1246_v24  ;;  %1901 = vset.pattern.permute.xlu0 %v2075_v1  ;;  %1902 = vset.pattern.permute.xlu2 %v2075_v1 }
 0x508   : > { %v1899_v29 = vunpack.i.l.bf16 %v1898_v27  ;;  %1930 = vrcp.f32 %v1134_v30  ;;  %v1900_v32 = vunpack.i.h.bf16 %v1898_v27  ;;  %1414 = vmatpush.msra.mxu3 %v1389_v3 }
 0x509   : > { %v1139_v31 = vsub.f32 2.0, %v1137_v28 }
 0x50a   : > { %1278 = vmatpush.msra.mxu1 %v1899_v29  ;;  %1415 = vmatpush.msra.mxu3 %v1388_v4 }
 0x50b   : > { %v1141_v33 = vmul.f32 %v1929_v25, %v1139_v31 }
 0x50c   : > { %1279 = vmatpush.msra.mxu1 %v1900_v32  ;;  %1416 = vmatpush.msra.mxu3 %v1387_v5 }
 0x50d   : > { %1818 = vmatmul.msk.f32.vlgmr.msra.gmra.mxu1 %vm1116_vm10, %v1245_v17  ;;  %v1143_v35 = vmul.f32 %v1921_v6, %v1141_v33 }
 0x50e   : > { %v1931_v36 = vpop.eup %1930 }
 0x50f   : > { %v1138_v37 = vmul.f32 %v1931_v36, %v1134_v30  ;;  %1810 = vmatmul.msk.f32.vlgmr.msrb.gmra.mxu3 %vm1116_vm10, %v1143_v35  ;;  %1145 = vst.msk [vmem:[%s2391_s24] sm:$0xff] %vm1116_vm10, %v1143_v35 }
 0x511   : > { %v1140_v38 = vsub.f32 2.0, %v1138_v37 }
 0x513   : > { %v1142_v39 = vmul.f32 %v1931_v36, %v1140_v38  ;;  %v1427_v38 = vld [vmem:[%s2599_s17 + $0x8] sm:$0xff] }
 0x515   : > { %1819 = vmatmul.msk.f32.gmra.mxu1 %vm1116_vm10, %v1246_v24  ;;  %v1144_v40 = vmul.f32 %v1923_v8, %v1142_v39  ;;  %v1426_v39 = vld [vmem:[%s2599_s17] sm:$0xff] }
 0x517   : > { %1811 = vmatmul.msk.f32.gmra.mxu3 %vm1116_vm10, %v1144_v40  ;;  %1146 = vst.msk [vmem:[%s2391_s24 + $0x8] sm:$0xff] %vm1116_vm10, %v1144_v40  ;;  %v1908_v40 = vld [vmem:[%s2598_s16] ss:$0 sm:$0xff] }
 0x58a   : > { %v1281_v41 = vpop.f32.mrf.mxu1 }
 0x58b   : > { %1289 = vrot.lane.b32.xlu2 %v1281_v41, %s2620_s1 }
 0x592   : > { %v1284_v42 = vpop.f32.mrf.mxu1  ;;  %v1170_v43 = vpop.f32.mrf.mxu3 }
 0x593   : > { %1291 = vrot.lane.b32.xlu1 %v1284_v42, %s2620_s1  ;;  %1176 = vst.msk [vmem:[#allocation2] sm:$0xff] %vm852_vm1, %v1170_v43  ;;  %s2500_s1 = scalar_lea.hbm %s2663_s22, %s1833_s25 }
 0x594   : > { %s1625_s25 = sshll.u32 %s2500_s1, 4  ;;  %s1626_s25 = int_to_ptr.hbm [resolvable:$true] %s1625_s25 }
 0x59a   : > { %v1173_v44 = vpop.f32.mrf.mxu3 }
 0x59b   : > { %1177 = vst.msk [vmem:[#allocation2 + $0x8] sm:$0xff] %vm852_vm1, %v1173_v44 }
 0x5e5   : > { %v1290_v47 = vpop.permute.xlu2 %1289 }
 0x5e6   : > { %1296 = vst.msk [vmem:[#allocation2] sm:$0xff] %vm1295_vm12, %v1290_v47  ;;  %v1909_v47 = vld [vmem:[%s2600_s18] ss:$0 sm:$0xff] }
 0x5ed   : > { %v1298_v48 = vld [vmem:[#allocation2] sm:$0xff] }
 0x5ee   : > { %1820 = vmatmul.msk.f32.vlgmr.msrb.gmra.mxu2 %vm1116_vm10, %v1298_v48 }
 0x605   : > { %v1292_v49 = vpop.permute.xlu1 %1291 }
 0x606   : > { %1297 = vst.msk [vmem:[#allocation2 + $0x8] sm:$0xff] %vm1295_vm12, %v1292_v49 }
 0x60d   : > { %v1299_v50 = vld [vmem:[#allocation2 + $0x8] sm:$0xff] }
 0x60e   : > { %1821 = vmatmul.msk.f32.gmra.mxu2 %vm1116_vm10, %v1299_v50 }
 0x671   : > { %v1325_v51 = vpop.f32.mrf.mxu2 }
 0x672   : > { %v2418_v52 = vadd.f32 %v1325_v51, %v2287_v21 }
 0x674   : > { %v1331_v53 = vsel %vm826_vm0, %v2418_v52, 0.0 }
 0x675   : > { %1332 = vadd.xlane.f32.xlu1 %v1331_v53 }
 0x691   : > { %v1328_v54 = vpop.f32.mrf.mxu2 }
 0x692   : > { %v2423_v55 = vadd.f32 %v1328_v54, %v2291_v26 }
 0x694   : > { %v1334_v56 = vsel %vm826_vm0, %v2423_v55, 0.0 }
 0x695   : > { %1335 = vadd.xlane.f32.xlu0 %v1334_v56 }
 0x6e8   : > { %v1333_v57 = vpop.xlane.xlu1 %1332 }
 0x6e9   : > { %v1337_v58 = vmul.f32 %v1333_v57, %v2295_v34 }
 0x6eb   : > { %v1339_v59 = vsub.f32 %v2418_v52, %v1337_v58 }
 0x6ed   : > { %v1341_v60 = vmul.f32 %v1339_v59, %v1339_v59 }
 0x6ef   : > { %v1343_v21 = vsel %vm826_vm0, %v1341_v60, 0.0 }
 0x6f0   : > { %1344 = vadd.xlane.f32.xlu2 %v1343_v21 }
 0x708   : > { %v1336_v61 = vpop.xlane.xlu0 %1335 }
 0x709   : > { %v1338_v62 = vmul.f32 %v1336_v61, %v2295_v34 }
 0x70b   : > { %v1340_v63 = vsub.f32 %v2423_v55, %v1338_v62 }
 0x70d   : > { %v1342_v26 = vmul.f32 %v1340_v63, %v1340_v63 }
 0x70f   : > { %v1346_v0 = vsel %vm826_vm0, %v1342_v26, 0.0 }
 0x710   : > { %1347 = vadd.xlane.f32.xlu1 %v1346_v0 }
 0x763   : > { %v1345_v6 = vpop.xlane.xlu2 %1344 }
 0x764   : > { %v1349_v7 = vmul.f32 %v1345_v6, %v2295_v34 }
 0x766   : > { %v1351_v8 = vadd.f32 1e-06, %v1349_v7 }
 0x768   : > { %1932 = vrsqrt.f32 %v1351_v8  ;;  %vm1359_vm14 = vweird.f32 %v1351_v8 }
 0x76e   : > { %v1933_v9 = vpop.eup %1932 }
 0x76f   : > { %v1354_v10 = vmul.f32 %v1933_v9, %v1351_v8  ;;  %vm1360_vm13 = vweird.f32 %v1933_v9 }
 0x770   : > { %vm1361_vm15 = vmor %vm1359_vm14, %vm1360_vm13 }
 0x771   : > { %v1355_v11 = vmul.f32 %v1933_v9, %v1354_v10 }
 0x773   : > { %v1356_v12 = vmul.f32 0.5, %v1355_v11 }
 0x775   : > { %v1357_v13 = vsub.f32 1.5, %v1356_v12 }
 0x777   : > { %v1358_v14 = vmul.f32 %v1933_v9, %v1357_v13 }
 0x779   : > { %v1362_v16 = vsel %vm1361_vm15, %v1933_v9, %v1358_v14 }
 0x77a   : > { %v1373_v17 = vmul.f32 %v1362_v16, %v1339_v59 }
 0x77c   : > { %v1379_v19 = vmul.f32 %v1906_v15, %v1373_v17 }
 0x77e   : > { %v1385_v20 = vadd.f32 %v1907_v18, %v1379_v19 }
 0x780   : > { %1822 = vmatmul.msk.f32.vlgmr.msra.gmra.mxu3 %vm826_vm0, %v1385_v20 }
 0x783   : > { %v1348_v23 = vpop.xlane.xlu1 %1347 }
 0x784   : > { %v1350_v24 = vmul.f32 %v1348_v23, %v2295_v34  ;;  %v1428_v34 = vld [vmem:[%s2599_s17 + $0x10] sm:$0xff] }
 0x785   : > { %1453 = vmatpush.msrb.mxu0 %v1428_v34 }
 0x786   : > { %v1352_v25 = vadd.f32 1e-06, %v1350_v24 }
 0x787   : > { %1454 = vmatpush.msrb.mxu0 %v1427_v38 }
 0x788   : > { %1934 = vrsqrt.f32 %v1352_v25  ;;  %vm1369_vm2 = vweird.f32 %v1352_v25 }
 0x789   : > { %1455 = vmatpush.msrb.mxu0 %v1426_v39 }
 0x78e   : > { %v1935_v27 = vpop.eup %1934 }
 0x78f   : > { %v1364_v28 = vmul.f32 %v1935_v27, %v1352_v25  ;;  %vm1370_vm1 = vweird.f32 %v1935_v27 }
 0x790   : > { %vm1371_vm3 = vmor %vm1369_vm2, %vm1370_vm1 }
 0x791   : > { %v1365_v29 = vmul.f32 %v1935_v27, %v1364_v28  ;;  %v1539_v28 = vld [vmem:[%s2601_s19] sm:$0xff] }
 0x793   : > { %v1366_v30 = vmul.f32 0.5, %v1365_v29  ;;  %v1540_v29 = vld [vmem:[%s2601_s19 + $0x8] sm:$0xff] }
 0x795   : > { %v1367_v31 = vsub.f32 1.5, %v1366_v30 }
 0x797   : > { %v1368_v32 = vmul.f32 %v1935_v27, %v1367_v31 }
 0x799   : > { %v1372_v33 = vsel %vm1371_vm3, %v1935_v27, %v1368_v32 }
 0x79a   : > { %v1374_v35 = vmul.f32 %v1372_v33, %v1340_v63 }
 0x79c   : > { %v1380_v36 = vmul.f32 %v1906_v15, %v1374_v35 }
 0x79e   : > { %v1386_v37 = vadd.f32 %v1907_v18, %v1380_v36 }
 0x7a0   : > { %1823 = vmatmul.msk.f32.gmra.mxu3 %vm826_vm0, %v1386_v37 }
 0x803   : > { %v1418_v41 = vpop.f32.mrf.mxu3 }
 0x804   : > { %v1419_v42 = vadd.f32 %v1908_v40, %v1418_v41 }
 0x806   : > { %v1424_v43 = vmax.f32 %v1419_v42, 0.0 }
 0x808   : > { %1824 = vmatmul.msk.f32.vlgmr.msrb.gmra.mxu0 %vm826_vm0, %v1424_v43 }
 0x823   : > { %v1421_v44 = vpop.f32.mrf.mxu3 }
 0x824   : > { %v1422_v45 = vadd.f32 %v1908_v40, %v1421_v44 }
 0x826   : > { %v1425_v46 = vmax.f32 %v1422_v45, 0.0 }
 0x828   : > { %1825 = vmatmul.msk.f32.gmra.mxu0 %vm826_vm0, %v1425_v46 }
 0x885   : > { %v1457_v48 = vpop.f32.mrf.mxu0 }
 0x886   : > { %v1458_v49 = vadd.f32 %v1909_v47, %v1457_v48 }
 0x888   : > { %v1463_v50 = vadd.f32 %v1458_v49, %v2418_v52  ;;  %v1541_v52 = vld [vmem:[%s2602_s20] sm:$0xff] }
 0x889   : > { %1545 = vperm.xlu0 %1901, %v1541_v52  }
 0x88a   : > { %1465 = vxpose.xlu1.b32.start [1/2] (short) (narrow) %v1463_v50, 32 }
 0x8a5   : > { %v1460_v51 = vpop.f32.mrf.mxu0 }
 0x8a6   : > { %v1461_v53 = vadd.f32 %v1909_v47, %v1460_v51 }
 0x8a8   : > { %v1464_v54 = vadd.f32 %v1461_v53, %v2423_v55  ;;  %v1542_v55 = vld [vmem:[%s2602_s20 + $0x8] sm:$0xff] }
 0x8a9   : > { %1550 = vperm.xlu2 %1902, %v1542_v55  }
 0x8aa   : > { %1466 = vxpose.xlu1.b32.end [2/2] (short) (narrow) %v1464_v54, 32 }
 0x8fb   : > { %v1546_v30 = vpop.permute.xlu0 %1545 }
 0x903   : > { %v1551_v36 = vpop.permute.xlu2 %1550 }
 0x946   : > { %v1481_v56 = vpop.trf.xlu1 }
 0x947   : > { %v1826_v57 = vmul.f32 -1.442695, %v1481_v56 }
 0x949   : > { %1936 = vpow2.f32 %v1826_v57 }
 0x94e   : > { %v1482_v58 = vpop.trf.xlu1 }
 0x94f   : > { %v1937_v59 = vpop.eup %1936  ;;  %v1827_v60 = vmul.f32 -1.442695, %v1482_v58 }
 0x950   : > { %v1503_v21 = vadd.f32 1.0, %v1937_v59 }
 0x951   : > { %1938 = vpow2.f32 %v1827_v60 }
 0x952   : > { %1940 = vrcp.f32 %v1503_v21  ;;  %vm1510_vm4 = vweird.f32 %v1503_v21  ;;  %v1516_v11 = vand.u32 2147483648, %v1503_v21  ;;  %v1514_v14 = vand.u32 2147483647, %v1503_v21 }
 0x954   : > { %v1517_v19 = vor.u32 1.1754944e-38, %v1516_v11  ;;  %vm1515_vm11 = vcmp.eq.f32.partialorder %v1514_v14, 8.507059e+37 }
 0x956   : > { %v1483_v61 = vpop.trf.xlu1 }
 0x957   : > { %v1939_v62 = vpop.eup %1938 }
 0x958   : > { %v1941_v63 = vpop.eup %1940  ;;  %v1504_v26 = vadd.f32 1.0, %v1939_v62 }
 0x959   : > { %v1506_v0 = vmul.f32 %v1941_v63, %v1503_v21  ;;  %vm1511_vm0 = vweird.f32 %v1941_v63 }
 0x95a   : > { %1942 = vrcp.f32 %v1504_v26  ;;  %v1531_v10 = vand.u32 2147483648, %v1504_v26  ;;  %v1529_v13 = vand.u32 2147483647, %v1504_v26  ;;  %vm1512_vm6 = vmor %vm1510_vm4, %vm1511_vm0  ;;  %vm1525_vm7 = vweird.f32 %v1504_v26 }
 0x95b   : > { %v1507_v3 = vsub.f32 1.0, %v1506_v0 }
 0x95c   : > { %v1532_v18 = vor.u32 1.1754944e-38, %v1531_v10  ;;  %vm1530_vm9 = vcmp.eq.f32.partialorder %v1529_v13, 8.507059e+37 }
 0x95d   : > { %v1508_v5 = vmul.f32 %v1941_v63, %v1507_v3 }
 0x95e   : > { %v1484_v4 = vpop.trf.xlu1 }
 0x95f   : > { %1944 = vtanh.f32 %v1484_v4  ;;  %v1509_v9 = vadd.f32 %v1941_v63, %v1508_v5 }
 0x960   : > { %v1943_v6 = vpop.eup %1942  ;;  %1946 = vtanh.f32 %v1483_v61 }
 0x961   : > { %v1521_v7 = vmul.f32 %v1943_v6, %v1504_v26  ;;  %vm1526_vm5 = vweird.f32 %v1943_v6  ;;  %v1513_v16 = vsel %vm1512_vm6, %v1941_v63, %v1509_v9 }
 0x962   : > { %vm1527_vm8 = vmor %vm1525_vm7, %vm1526_vm5  ;;  %v1518_v24 = vsel %vm1515_vm11, %v1517_v19, %v1513_v16 }
 0x963   : > { %v1522_v8 = vsub.f32 1.0, %v1521_v7 }
 0x965   : > { %v1523_v12 = vmul.f32 %v1943_v6, %v1522_v8  ;;  %v1945_v17 = vpop.eup %1944 }
 0x966   : > { %v1947_v22 = vpop.eup %1946 }
 0x967   : > { %v1524_v15 = vadd.f32 %v1943_v6, %v1523_v12  ;;  %v1537_v27 = vmul.f32 %v1947_v22, %v1518_v24 }
 0x969   : > { %v1528_v20 = vsel %vm1527_vm8, %v1943_v6, %v1524_v15 }
 0x96a   : > { %v1533_v23 = vsel %vm1530_vm9, %v1532_v18, %v1528_v20 }
 0x96b   : > { %v1538_v25 = vmul.f32 %v1945_v17, %v1533_v23 }
 0x96d   : > { %1573 = vmatpush.msrb.mxu1 %v1538_v25 }
 0x96f   : > { %1574 = vmatpush.msrb.mxu1 %v1537_v27 }
 0x970   : > { %1828 = vmatmul.msk.f32.vlgmr.msrb.gmra.mxu1 %vm1116_vm10, %v1539_v28 }
 0x978   : > { %1829 = vmatmul.msk.f32.gmra.mxu1 %vm1116_vm10, %v1540_v29 }
 0x9ed   : > { %v1576_v31 = vpop.f32.mrf.mxu1 }
 0x9ee   : > { %v1577_v32 = vadd.f32 %v1576_v31, %v1546_v30 }
 0x9f0   : > { %v1582_v33 = vadd.f32 %v1577_v32, %v2258_v2 }
 0x9f2   : > { %v1583_v35 = vmul.f32 0.70710677, %v1582_v33 }
 0x9f4   : > { %1584 = vst.msk [vmem:[%s729_s3] sm:$0xff] %vm1116_vm10, %v1583_v35 }
 0x9f5   : > { %v1579_v2 = vpop.f32.mrf.mxu1 }
 0x9f6   : > { %1975 = shalt.err (!%p1972_p3)
}
 0x9f7   : > { %1841 = dma.vmem_to_hbm [thread:$0]  (%p2237_p5), %s1610_s0, 128, %s1612_s8, %s1587_s4   ;;  %v1580_v37 = vadd.f32 %v1579_v2, %v1551_v36 }
 0x9f8   : > { %s2666_s11 = sand.u32 1, %s2218_s5   ;;  %s1990_s13 = sshra.s32 %s1626_s25, 4  ;;  %s1991_s13 = int_to_ptr.hbm [resolvable:$true] %s1990_s13 }
 0x9f9   : > { %1585 = vst.msk [vmem:[%s2504_s9] sm:$0xff] %vm1116_vm10, %v1580_v37  ;;  %s2534_s2 = scalar_lea.sflag [#allocation6], %s2666_s11  ;;  %s1992_s3 = scalar_lea.hbm %s1991_s13, 8 }
 0x9fa   : > { %p1993_p4 = scmp.ne.s32.totalorder %s1991_s13, %s1992_s3  ;;  %s1996_s0 = scalar_lea.hbm %s2663_s22, 16 }
 0x9fb   : > { %p1997_p9 = scmp.lt.s32.totalorder %s1991_s13, %s2663_s22  ;;  %p1998_p10 = scmp.lt.s32.totalorder %s1996_s0, %s1992_s3 }
 0x9fc   : > { %p1994_p7 = pnand %p1993_p4, %p2237_p5 }
 0x9fd   : > { %p1999_p11 = por %p1998_p10, %p1997_p9 }
 0x9fe   : > { %p1995_p8 = pneg %p1994_p7 }
 0xa00   : > { %p2000_p12 = pnand %p1999_p11, %p1995_p8 }
 0xa02   : > { %2003 = shalt.err (!%p2000_p12)
}
 0xa03   : > { %1842 = dma.vmem_to_hbm [thread:$0]  (%p2237_p5), %s2512_s26, 128, %s1626_s25, %s2534_s2  }
 0xa04   : > { %s2018_s9 = sshra.s32 %s2528_s28, 4  ;;  %s2024_s1 = scalar_lea.hbm %s2664_s10, 64  ;;  %s2019_s9 = int_to_ptr.hbm [resolvable:$true] %s2018_s9 }
 0xa05   : > { %s2020_s5 = scalar_lea.hbm %s2019_s9, 32  ;;  %p2025_p2 = scmp.lt.s32.totalorder %s2019_s9, %s2664_s10 }
 0xa06   : > { %p2021_p13 = scmp.ne.s32.totalorder %s2019_s9, %s2020_s5  ;;  %p2026_p3 = scmp.lt.s32.totalorder %s2024_s1, %s2020_s5 }
 0xa08   : > { %p2022_p0 = pnand %p2021_p13, %p2237_p5  ;;  %p2027_p4 = por %p2026_p3, %p2025_p2 }
 0xa0a   : > { %p2023_p1 = pneg %p2022_p0 }
 0xa0c   : > { %p2028_p7 = pnand %p2027_p4, %p2023_p1 }
 0xa0e   : > { %2031 = shalt.err (!%p2028_p7)
}
 0xa0f   : > { %s2076_s26 = smov 128   ;;  %s2667_s25 = smov 8  }
 0xa10   : > { %1843 = dma.vmem_to_hbm [thread:$0]  (%p2237_p5), %s2526_s29, 512, %s2528_s28, %s2534_s2, %s2076_s26, %s2076_s26, %s2667_s25  }
 0xa11 PF: > { %s2668_s13 = sld [smem:[#allocation12_spill]] }
 0xa12   : > { %s2669_s3 = sld [smem:[#allocation10_spill]] }
 0xa17   : > { %p1857_p8 = scmp.ge.s32.totalorder %s2668_s13, 2 }
 0xa18   : > { %s1654_s8 = sand.u32 1, %s2669_s3  }
 0xa19   : > { %p1848_p9 = pnand %p1857_p8, %p2241_p6  ;;  %s1655_s0 = scalar_lea.sflag [#allocation4], %s1654_s8 }
 0xa1b   : > { %p1849_p10 = pneg %p1848_p9 }
 0xa1d   : > { %2049 = dma.done.wait (%p1849_p10), %s1655_s0, 128  }
 0xa1e   : > { %2051 = vsyncadd (%p1849_p10), %s1655_s0, 4294967168  ;;  %s2671_s4 = sadd.s32 4294967294, %s2668_s13  }
 0xa1f   : > { %s1664_s12 = sand.u32 1, %s2671_s4  }
 0xa20   : > { %s1665_s6 = scalar_lea.sflag [#allocation6], %s1664_s12 }
 0xa21   : > { %2053 = dma.done.wait (%p1849_p10), %s1665_s6, 640  }
 0xa22   : > { %2055 = vsyncadd (%p1849_p10), %s1665_s6, 4294966656  ;;  %s2672_s25 = sld [smem:[#allocation13_spill]]  ;;  %s2675_s4 = smov %s2062_s30 }
 0xa23   : > { %s2673_s29 = sld [smem:[#allocation11_spill]] }
 0xa24   : > { %s2674_s24 = sld [smem:[#allocation14_spill]] }
 0xa28   : > { %p37_p5 = scmp.ge.s32.totalorder %s2672_s25, 4  }
 0xa29   : > { %s2676_s30 = smov %s2673_s29 }
 0xa2a   :  { %39 = sbr.rel (!%p37_p5) target bundleno = 23 (0x17), region = 178 }
 0xa2f   :  { %1681 = vsyncpa [#allocation4], 1 }
 0xa30   :  { %1683 = vsyncpa [#allocation4 + $0x1], 1 }
 0xa31   :  { %1684 = vsyncpa [#allocation6], 1 }
 0xa32   :  { %1686 = vsyncpa [#allocation6 + $0x1], 1 }

</bundles_post_ra>
